<compile_context>
chip_gen: v7x
topology: tpu7x:2x2x1
jax: 0.10.0
libtpu: 0.0.40
codegen_flags: <defaults>
</compile_context>

<pallas_src>
import jax
import jax.numpy as jnp
from jax.experimental import pallas as pl
from jax.experimental.pallas import tpu as pltpu


# ----------------------------- packed layout --------------------------------

H_GENDER, H_AGE, H_RACE = 512, 1024, 1024
H_TOT = H_GENDER + H_AGE + H_RACE          # 2560 fused hidden width
OUT_W = 128                                # lane-dense output slab width
GENDER_COL = 0
AGE_LO, AGE_HI = 1, 10                     # 9 age logits
RACE_LO, RACE_HI = 10, 17                  # 7 race logits


# ------------------------------- kernel -------------------------------------


def _fused_heads_kernel(x_ref, w1_ref, b1_ref, w2_ref, b2_ref, o_ref, h_acc):
    """Fused gender/age/race heads with K-tiled layer-1 accumulation.

    Grid = (batch blocks, K chunks).  Per K chunk:
        h_acc += x_k @ W1_k            # [tb, 2560], f32 MXU accumulation
    On the last K chunk:
        h = relu(h_acc + b1)
        y = h_bf16 @ W2_cat + b2       # [tb, 128], lane-dense second matmul
        y[:, 0] = sigmoid(y[:, 0])     # gender column only
    """
    k = pl.program_id(1)

    @pl.when(k == 0)
    def _():
        h_acc[...] = jnp.zeros_like(h_acc)

    h_acc[...] += jnp.dot(x_ref[...], w1_ref[...],
                          preferred_element_type=jnp.float32)

    @pl.when(k == pl.num_programs(1) - 1)
    def _():
        h = jnp.maximum(h_acc[...] + b1_ref[...], 0.0)             # bias + ReLU
        # bf16 re-quantization of h for the second MXU pass is a deliberate
        # accuracy/perf tradeoff (validated against a bf16-matched reference).
        y = jnp.dot(h.astype(w2_ref.dtype), w2_ref[...],
                    preferred_element_type=jnp.float32) + b2_ref[...]
        o_ref[...] = y.astype(o_ref.dtype)                         # unmasked 128-wide store
        # Sigmoid only on the gender column: tb transcendentals, not tb*128.
        g = y[:, GENDER_COL:GENDER_COL + 1]
        o_ref[:, GENDER_COL:GENDER_COL + 1] = (
            1.0 / (1.0 + jnp.exp(-g))).astype(o_ref.dtype)


# ------------------------------ wrapper --------------------------------------


def _round_up(n, m):
    return ((n + m - 1) // m) * m


def classifier_fused_forward(packed, x):
    """Runs the fused three-head kernel; returns the packed [B, 128] f32 slab."""
    w1, b1, w2, b2 = packed
    B, F = x.shape

    # Batch tiling: multiples of 16 (bf16 packs 16 rows per sublane group);
    # once B >= 32, use >=2 batch blocks so the "parallel" axis can shard
    # across v7x's two TensorCores.  Cap at 256 rows per block.
    if B < 32:
        tb = _round_up(B, 16)
    else:
        tb = min(256, _round_up((B + 1) // 2, 16))
    bp = _round_up(B, tb)

    # Feature (K) tiling: single resident W1 chunk for small F; for large F
    # split onto an "arbitrary" grid axis so the W1 DMA double-buffers and
    # streams behind the MXU, and so W1 never has to sit whole in VMEM
    # (v7x has only 64 MiB physical / 32 MiB default scoped VMEM).
    if F <= 2048:
        tk, nk = F, 1
    else:
        tk = 1024                      # multiple of 128 -> clean lane tiling
        nk = -(-F // tk)
    fp = tk * nk

    if bp != B or fp != F:
        x = jnp.pad(x, ((0, bp - B), (0, fp - F)))
    x = x.astype(jnp.bfloat16)
    if fp != F:
        w1 = jnp.pad(w1, ((0, fp - F), (0, 0)))

    resident = pl.Buffered(1)          # constant index_map -> no double buffer
    if nk == 1:
        w1_spec = pl.BlockSpec((tk, H_TOT), lambda i, k: (k, 0),
                               pipeline_mode=resident)
    else:
        w1_spec = pl.BlockSpec((tk, H_TOT), lambda i, k: (k, 0))   # streamed

    flops = 2 * bp * (fp * H_TOT + H_TOT * OUT_W)
    bytes_accessed = (bp * fp * 2 + fp * H_TOT * 2 + H_TOT * 4
                      + H_TOT * OUT_W * 2 + OUT_W * 4 + bp * OUT_W * 4)

    # Explicit scoped-VMEM budget: tiles + resident weights + h intermediate
    # (f32 accumulator + bf16 cast) with ~50% headroom, capped at 64 MiB.
    vmem_bytes = int(1.5 * (
        2 * tb * tk * 2                               # x tile (2 bufs, bf16)
        + (1 if nk == 1 else 2) * tk * H_TOT * 2      # W1 chunk(s) (bf16)
        + H_TOT * OUT_W * 2                           # W2 (bf16, single buf)
        + (H_TOT + OUT_W) * 4                         # biases (f32)
        + 2 * tb * OUT_W * 4                          # out tile (2 bufs, f32)
        + tb * H_TOT * 4                              # h accumulator scratch
        + tb * H_TOT * 2))                            # bf16 cast of h
    vmem_bytes = min(max(vmem_bytes, 8 * 1024 * 1024), 64 * 1024 * 1024)

    out = pl.pallas_call(
        _fused_heads_kernel,
        out_shape=jax.ShapeDtypeStruct((bp, OUT_W), jnp.float32),
        grid=(bp // tb, nk),
        in_specs=[
            pl.BlockSpec((tb, tk), lambda i, k: (i, k)),           # x
            w1_spec,                                               # W1_cat
            pl.BlockSpec((1, H_TOT), lambda i, k: (0, 0),
                         pipeline_mode=resident),                  # b1_cat
            pl.BlockSpec((H_TOT, OUT_W), lambda i, k: (0, 0),
                         pipeline_mode=resident),                  # W2_cat
            pl.BlockSpec((1, OUT_W), lambda i, k: (0, 0),
                         pipeline_mode=resident),                  # b2_cat
        ],
        out_specs=pl.BlockSpec((tb, OUT_W), lambda i, k: (i, 0)),
        scratch_shapes=[pltpu.VMEM((tb, H_TOT), jnp.float32)],
        compiler_params=pltpu.CompilerParams(
            dimension_semantics=("parallel", "arbitrary"),
            vmem_limit_bytes=vmem_bytes),
        cost_estimate=pl.CostEstimate(
            flops=flops,
            transcendentals=bp,
            bytes_accessed=bytes_accessed),
    )(x, w1, b1, w2, b2)
    return out[:B]


def classifier_forward(packed, x, task="ALL"):
    """Mirrors Classifier.forward; task in {GENDER, AGE, RACE, GENDER_AGE,
    GENDER_RACE, AGE_RACE, ALL}. All heads share one fused kernel (the
    non-requested heads cost nothing extra at these shapes)."""
    out = classifier_fused_forward(packed, x)
    gender = out[:, GENDER_COL:GENDER_COL + 1]
    age = out[:, AGE_LO:AGE_HI]
    race = out[:, RACE_LO:RACE_HI]

    if task == "GENDER":
        return gender
    if task == "AGE":
        return age
    if task == "RACE":
        return race
    if task == "GENDER_AGE":
        return gender, age
    if task == "GENDER_RACE":
        return gender, race
    if task == "AGE_RACE":
        return age, race
    if task == "ALL":
        return gender, age, race
    raise ValueError(f"unknown task {task}")


# ----------------------------- parameters ------------------------------------


def _init_linear(key, fan_in, fan_out):
    """PyTorch-style nn.Linear init: U(-1/sqrt(fan_in), 1/sqrt(fan_in))."""
    kw, kb = jax.random.split(key)
    bound = 1.0 / jnp.sqrt(jnp.float32(fan_in))
    w = jax.random.uniform(kw, (fan_in, fan_out), jnp.float32, -bound, bound)
    b = jax.random.uniform(kb, (fan_out,), jnp.float32, -bound, bound)
    return w, b


def init_classifier_params(key, in_features):
    ks = jax.random.split(key, 6)
    return {
        "gender": (*_init_linear(ks[0], in_features, H_GENDER),
                   *_init_linear(ks[1], H_GENDER, 1)),
        "age": (*_init_linear(ks[2], in_features, H_AGE),
                *_init_linear(ks[3], H_AGE, 9)),
        "race": (*_init_linear(ks[4], in_features, H_RACE),
                 *_init_linear(ks[5], H_RACE, 7)),
    }


def pack_classifier_params(params):
    """Packs the three heads for the fused kernel (done once, not per call).

    W1_cat [F, 2560] bf16, b1_cat [1, 2560] f32,
    W2_cat [2560, 128] bf16 block-diagonal, b2_cat [1, 128] f32.
    """
    w1g, b1g, w2g, b2g = params["gender"]
    w1a, b1a, w2a, b2a = params["age"]
    w1r, b1r, w2r, b2r = params["race"]

    w1 = jnp.concatenate([w1g, w1a, w1r], axis=1)                 # [F, 2560]
    b1 = jnp.concatenate([b1g, b1a, b1r], axis=0)[None, :]        # [1, 2560]

    w2 = jnp.zeros((H_TOT, OUT_W), jnp.float32)
    w2 = w2.at[0:H_GENDER, GENDER_COL:GENDER_COL + 1].set(w2g)
    w2 = w2.at[H_GENDER:H_GENDER + H_AGE, AGE_LO:AGE_HI].set(w2a)
    w2 = w2.at[H_GENDER + H_AGE:H_TOT, RACE_LO:RACE_HI].set(w2r)

    b2 = jnp.zeros((OUT_W,), jnp.float32)
    b2 = b2.at[GENDER_COL].set(b2g[0])
    b2 = b2.at[AGE_LO:AGE_HI].set(b2a)
    b2 = b2.at[RACE_LO:RACE_HI].set(b2r)
    b2 = b2[None, :]

    return (w1.astype(jnp.bfloat16), b1, w2.astype(jnp.bfloat16), b2)


# -------------------------------- main ----------------------------------------

if __name__ == "__main__":
    key = jax.random.PRNGKey(0)
    kx, kp = jax.random.split(key)

    B, in_features = 2, 32
    x = jax.random.normal(kx, (B, in_features), jnp.float32)

    params = init_classifier_params(kp, in_features)
    packed = pack_classifier_params(params)

    g, a, r = classifier_forward(packed, x, task="ALL")
    jax.block_until_ready((g, a, r))

    assert g.shape == (B, 1)
    assert a.shape == (B, 9)
    assert r.shape == (B, 7)

    # Reference with matched bf16 quantization (f32 accumulation) -> tight check.
    def ref_head_bf16(xq, w1, b1, w2, b2, sig):
        q = lambda t: t.astype(jnp.bfloat16).astype(jnp.float32)
        h = jnp.maximum(xq @ q(w1) + b1[None, :], 0.0)
        y = q(h) @ q(w2) + b2[None, :]
        return 1.0 / (1.0 + jnp.exp(-y)) if sig else y

    xq = x.astype(jnp.bfloat16).astype(jnp.float32)
    g_ref = ref_head_bf16(xq, *params["gender"], True)
    a_ref = ref_head_bf16(xq, *params["age"], False)
    r_ref = ref_head_bf16(xq, *params["race"], False)
    assert jnp.allclose(g, g_ref, atol=2e-3), "gender head mismatch (bf16 ref)"
    assert jnp.allclose(a, a_ref, atol=2e-3), "age head mismatch (bf16 ref)"
    assert jnp.allclose(r, r_ref, atol=2e-3), "race head mismatch (bf16 ref)"

    # Loose check against the full-f32 PyTorch-style reference (bf16 rounding only).
    def ref_head_f32(xf, w1, b1, w2, b2, sig):
        h = jnp.maximum(xf @ w1 + b1[None, :], 0.0)
        y = h @ w2 + b2[None, :]
        return 1.0 / (1.0 + jnp.exp(-y)) if sig else y

    g32 = ref_head_f32(x, *params["gender"], True)
    a32 = ref_head_f32(x, *params["age"], False)
    r32 = ref_head_f32(x, *params["race"], False)
    assert jnp.allclose(g, g32, atol=5e-2), "gender head drift vs f32 ref"
    assert jnp.allclose(a, a32, atol=5e-2), "age head drift vs f32 ref"
    assert jnp.allclose(r, r32, atol=5e-2), "race head drift vs f32 ref"

    print("KERNEL_OK")
</pallas_src>

<mosaic_0001>
module attributes {stable_mosaic.version = 11 : i64} {
  func.func @_fused_heads_kernel(%arg0: i32, %arg1: i32, %arg2: memref<16x32xbf16, #tpu.memory_space<vmem>>, %arg3: memref<32x2560xbf16, #tpu.memory_space<vmem>>, %arg4: memref<1x2560xf32, #tpu.memory_space<vmem>>, %arg5: memref<2560x128xbf16, #tpu.memory_space<vmem>>, %arg6: memref<1x128xf32, #tpu.memory_space<vmem>>, %arg7: memref<16x128xf32, #tpu.memory_space<vmem>>, %arg8: memref<16x2560xf32, #tpu.memory_space<vmem>>) attributes {dimension_semantics = [#tpu.dimension_semantics<parallel>, #tpu.dimension_semantics<arbitrary>], iteration_bounds = array<i64: 1, 1>, scalar_prefetch = 0 : i64, scratch_operands = 1 : i64, tpu.core_type = #tpu.core_type<tc>, window_params = [{transform_indices = @transform_0, window_bounds = array<i64: 16, 32>}, {pipeline_mode = #tpu.pipeline_mode<synchronous>, transform_indices = @transform_1, window_bounds = array<i64: 32, 2560>}, {pipeline_mode = #tpu.pipeline_mode<synchronous>, transform_indices = @transform_2, window_bounds = array<i64: 1, 2560>}, {pipeline_mode = #tpu.pipeline_mode<synchronous>, transform_indices = @transform_3, window_bounds = array<i64: 2560, 128>}, {pipeline_mode = #tpu.pipeline_mode<synchronous>, transform_indices = @transform_4, window_bounds = array<i64: 1, 128>}, {transform_indices = @transform_5, window_bounds = array<i64: 16, 128>}]} {
    %c0_i32 = arith.constant 0 : i32
    %0 = arith.cmpi eq, %arg1, %c0_i32 : i32
    %1 = arith.extui %0 : i1 to i32
    %c0_i32_0 = arith.constant 0 : i32
    %2 = arith.cmpi ne, %1, %c0_i32_0 : i32
    scf.if %2 {
      %cst_10 = arith.constant 0.000000e+00 : f32
      %12 = vector.broadcast %cst_10 : f32 to vector<16x2560xf32>
      %c0_11 = arith.constant 0 : index
      %c0_12 = arith.constant 0 : index
      %13 = vector.load %arg8[%c0_11, %c0_12] : memref<16x2560xf32, #tpu.memory_space<vmem>>, vector<16x2560xf32>
      tpu.vector_store %arg8[%c0_11, %c0_12], %12 {strides = array<i32>} : memref<16x2560xf32, #tpu.memory_space<vmem>>, vector<16x2560xf32>,
    } else {
    }
    %c0 = arith.constant 0 : index
    %c0_1 = arith.constant 0 : index
    %3 = vector.load %arg8[%c0, %c0_1] : memref<16x2560xf32, #tpu.memory_space<vmem>>, vector<16x2560xf32>
    %c0_2 = arith.constant 0 : index
    %c0_3 = arith.constant 0 : index
    %4 = vector.load %arg2[%c0_2, %c0_3] : memref<16x32xbf16, #tpu.memory_space<vmem>>, vector<16x32xbf16>
    %c0_4 = arith.constant 0 : index
    %c0_5 = arith.constant 0 : index
    %5 = vector.load %arg3[%c0_4, %c0_5] : memref<32x2560xbf16, #tpu.memory_space<vmem>>, vector<32x2560xbf16>
    %cst = arith.constant dense<0.000000e+00> : vector<16x2560xf32>
    %6 = tpu.matmul %4, %5, %cst {dimension_numbers = #tpu.dot_dimension_numbers<[1], [0], [0], [1], [0, 0, 1, 1], [], []>} : vector<16x32xbf16>, vector<32x2560xbf16>, vector<16x2560xf32> -> vector<16x2560xf32>
    %7 = arith.addf %3, %6 : vector<16x2560xf32>
    %c0_6 = arith.constant 0 : index
    %c0_7 = arith.constant 0 : index
    %8 = vector.load %arg8[%c0_6, %c0_7] : memref<16x2560xf32, #tpu.memory_space<vmem>>, vector<16x2560xf32>
    tpu.vector_store %arg8[%c0_6, %c0_7], %7 {strides = array<i32>} : memref<16x2560xf32, #tpu.memory_space<vmem>>, vector<16x2560xf32>,
    %c0_i32_8 = arith.constant 0 : i32
    %9 = arith.cmpi eq, %arg1, %c0_i32_8 : i32
    %10 = arith.extui %9 : i1 to i32
    %c0_i32_9 = arith.constant 0 : i32
    %11 = arith.cmpi ne, %10, %c0_i32_9 : i32
    scf.if %11 {
      %c0_10 = arith.constant 0 : index
      %c0_11 = arith.constant 0 : index
      %12 = vector.load %arg8[%c0_10, %c0_11] : memref<16x2560xf32, #tpu.memory_space<vmem>>, vector<16x2560xf32>
      %c0_12 = arith.constant 0 : index
      %c0_13 = arith.constant 0 : index
      %13 = vector.load %arg4[%c0_12, %c0_13] : memref<1x2560xf32, #tpu.memory_space<vmem>>, vector<1x2560xf32>
      %14 = vector.broadcast %13 : vector<1x2560xf32> to vector<16x2560xf32>
      %15 = arith.addf %12, %14 : vector<16x2560xf32>
      %cst_14 = arith.constant 0.000000e+00 : f32
      %16 = vector.broadcast %cst_14 : f32 to vector<16x2560xf32>
      %17 = arith.maximumf %15, %16 : vector<16x2560xf32>
      %18 = arith.truncf %17 : vector<16x2560xf32> to vector<16x2560xbf16>
      %c0_15 = arith.constant 0 : index
      %c0_16 = arith.constant 0 : index
      %19 = vector.load %arg5[%c0_15, %c0_16] : memref<2560x128xbf16, #tpu.memory_space<vmem>>, vector<2560x128xbf16>
      %cst_17 = arith.constant dense<0.000000e+00> : vector<16x128xf32>
      %20 = tpu.matmul %18, %19, %cst_17 {dimension_numbers = #tpu.dot_dimension_numbers<[1], [0], [0], [1], [0, 0, 1, 1], [], []>} : vector<16x2560xbf16>, vector<2560x128xbf16>, vector<16x128xf32> -> vector<16x128xf32>
      %c0_18 = arith.constant 0 : index
      %c0_19 = arith.constant 0 : index
      %21 = vector.load %arg6[%c0_18, %c0_19] : memref<1x128xf32, #tpu.memory_space<vmem>>, vector<1x128xf32>
      %22 = vector.broadcast %21 : vector<1x128xf32> to vector<16x128xf32>
      %23 = arith.addf %20, %22 : vector<16x128xf32>
      %c0_20 = arith.constant 0 : index
      %c0_21 = arith.constant 0 : index
      %24 = vector.load %arg7[%c0_20, %c0_21] : memref<16x128xf32, #tpu.memory_space<vmem>>, vector<16x128xf32>
      tpu.vector_store %arg7[%c0_20, %c0_21], %23 {strides = array<i32>} : memref<16x128xf32, #tpu.memory_space<vmem>>, vector<16x128xf32>,
      %25 = vector.extract_strided_slice %23 {offsets = [0, 0], sizes = [16, 1], strides = [1, 1]} : vector<16x128xf32> to vector<16x1xf32>
      %cst_22 = arith.constant 0.000000e+00 : f32
      %26 = vector.broadcast %cst_22 : f32 to vector<16x1xf32>
      %27 = arith.subf %26, %25 : vector<16x1xf32>
      %28 = math.exp %27 : vector<16x1xf32>
      %cst_23 = arith.constant 1.000000e+00 : f32
      %29 = vector.broadcast %cst_23 : f32 to vector<16x1xf32>
      %30 = arith.addf %29, %28 : vector<16x1xf32>
      %cst_24 = arith.constant 1.000000e+00 : f32
      %31 = vector.broadcast %cst_24 : f32 to vector<16x1xf32>
      %32 = arith.divf %31, %30 : vector<16x1xf32>
      %c0_25 = arith.constant 0 : index
      %c0_26 = arith.constant 0 : index
      %33 = vector.load %arg7[%c0_25, %c0_26] : memref<16x128xf32, #tpu.memory_space<vmem>>, vector<16x1xf32>
      tpu.vector_store %arg7[%c0_25, %c0_26], %32 {strides = array<i32>} : memref<16x128xf32, #tpu.memory_space<vmem>>, vector<16x1xf32>,
    } else {
    }
    return
  }
  func.func @transform_0(%arg0: i32, %arg1: i32) -> (i32, i32) {
    %c0_i32 = arith.constant 0 : i32
    return %arg0, %arg1 : i32, i32
  }
  func.func @transform_1(%arg0: i32, %arg1: i32) -> (i32, i32) {
    %c0_i32 = arith.constant 0 : i32
    %c0_i32_0 = arith.constant 0 : i32
    return %arg1, %c0_i32 : i32, i32
  }
  func.func @transform_2(%arg0: i32, %arg1: i32) -> (i32, i32) {
    %c0_i32 = arith.constant 0 : i32
    %c0_i32_0 = arith.constant 0 : i32
    %c0_i32_1 = arith.constant 0 : i32
    return %c0_i32, %c0_i32_0 : i32, i32
  }
  func.func @transform_3(%arg0: i32, %arg1: i32) -> (i32, i32) {
    %c0_i32 = arith.constant 0 : i32
    %c0_i32_0 = arith.constant 0 : i32
    %c0_i32_1 = arith.constant 0 : i32
    return %c0_i32, %c0_i32_0 : i32, i32
  }
  func.func @transform_4(%arg0: i32, %arg1: i32) -> (i32, i32) {
    %c0_i32 = arith.constant 0 : i32
    %c0_i32_0 = arith.constant 0 : i32
    %c0_i32_1 = arith.constant 0 : i32
    return %c0_i32, %c0_i32_0 : i32, i32
  }
  func.func @transform_5(%arg0: i32, %arg1: i32) -> (i32, i32) {
    %c0_i32 = arith.constant 0 : i32
    %c0_i32_0 = arith.constant 0 : i32
    return %arg0, %c0_i32 : i32, i32
  }
}

</mosaic_0001>

<bundles_post_ra>
// kernel: tpu_custom_call.1
= control target key start
LH: loop header
LB: loop body
LE: loop exit
PB: predicated region body
PF: predicated region fallthrough
CT: control target
= control target key end

     0   :  { %10 = vsyncpa [#allocation4], 0  ;;  %s3941_s0 = inlined_call_operand.hbm [shape: bf16[16,32], index: 0, kind: input, shape index: {}]   ;;  %s3942_s1 = inlined_call_operand.hbm [shape: bf16[32,2560], index: 1, kind: input, shape index: {}]   ;;  %s3943_s2 = inlined_call_operand.hbm [shape: f32[1,2560], index: 2, kind: input, shape index: {}]   ;;  %s3944_s3 = inlined_call_operand.hbm [shape: bf16[2560,128], index: 3, kind: input, shape index: {}]   ;;  %s3945_s4 = inlined_call_operand.vmem [shape: f32[1,128], index: 4, kind: input, shape index: {}]   ;;  %s3946_s5 = inlined_call_operand.hbm [shape: f32[16,128], index: 5, kind: output, shape index: {}]  }
   0x1   :  { %11 = vsyncpa [#allocation7], 0 }
   0x2   :  { %12 = vsyncpa [#allocation10], 0 }
   0x3   :  { %13 = vsyncpa [#allocation5], 0  ;;  %s3693_s18 = smov [#allocation6]   ;;  %s3575_s22 = scalar_lea.hbm %s3942_s1, 5120 }
   0x4   :  { %s31_s19 = sshll.u32 %s3693_s18, 4  ;;  %p3576_p0 = scmp.ne.s32.totalorder %s3942_s1, %s3575_s22  ;;  %s32_s19 = int_to_ptr.vmem [resolvable:$true] %s31_s19 }
   0x5   :  { %p3579_p1 = scmp.lt.u32.totalorder %s3575_s22, %s3942_s1 }
   0x7   :  { %p3581_p2 = pnand %p3579_p1, %p3576_p0 }
   0x9   :  { %3584 = shalt.err (!%p3581_p2)
}
   0xa   :  { %s3585_s27 = scalar_lea.vmem %s32_s19, 5120  ;;  %p3590_p4 = scmp.lt.s32.totalorder %s32_s19, %s32_s19 }
   0xb   :  { %p3586_p3 = scmp.ne.s32.totalorder %s32_s19, %s3585_s27  ;;  %p3591_p5 = scmp.lt.s32.totalorder %s3585_s27, %s3585_s27 }
   0xd   :  { %p3592_p6 = por %p3591_p5, %p3590_p4 }
   0xf   :  { %p3593_p7 = pnand %p3592_p6, %p3586_p3 }
  0x11   :  { %3596 = shalt.err (!%p3593_p7)
}
  0x12   :  { %s3694_s28 = smov 1280   ;;  %s3695_s29 = smov 80  }
  0x13   :  { %37 = dma.hbm_to_vmem [thread:$0]  %s3942_s1, 5120, %s32_s19, [#allocation7], %s3694_s28, %s3694_s28, %s3695_s29  }
  0x14   :  { %s3696_s7 = smov [#allocation3]   ;;  %s3597_s11 = scalar_lea.hbm %s3941_s0, 128 }
  0x15   :  { %s19_s8 = sshll.u32 %s3696_s7, 4  ;;  %p3598_p8 = scmp.ne.s32.totalorder %s3941_s0, %s3597_s11  ;;  %s20_s8 = int_to_ptr.vmem [resolvable:$true] %s19_s8 }
  0x16   :  { %p3601_p9 = scmp.lt.u32.totalorder %s3597_s11, %s3941_s0 }
  0x18   :  { %p3603_p10 = pnand %p3601_p9, %p3598_p8 }
  0x1a   :  { %3606 = shalt.err (!%p3603_p10)
}
  0x1b   :  { %s3607_s16 = scalar_lea.vmem %s20_s8, 128  ;;  %p3612_p12 = scmp.lt.s32.totalorder %s20_s8, %s20_s8 }
  0x1c   :  { %p3608_p11 = scmp.ne.s32.totalorder %s20_s8, %s3607_s16  ;;  %p3613_p13 = scmp.lt.s32.totalorder %s3607_s16, %s3607_s16 }
  0x1e   :  { %p3614_p0 = por %p3613_p13, %p3612_p12 }
  0x20   :  { %p3615_p1 = pnand %p3614_p0, %p3608_p11 }
  0x22   :  { %3618 = shalt.err (!%p3615_p1)
}
  0x23   :  { %s3697_s1 = smov 64   ;;  %s3698_s17 = smov 4  }
  0x24   :  { %25 = dma.hbm_to_vmem [thread:$0]  %s3941_s0, 128, %s20_s8, [#allocation4], %s3697_s1, %s3697_s1, %s3698_s17  }
  0x25   :  { %s3699_s20 = smov [#allocation8]   ;;  %s3700_s22 = smov [#allocation9]  }
  0x26   :  { %s44_s21 = sshll.u32 %s3699_s20, 4  ;;  %s53_s23 = sshll.u32 %s3700_s22, 4  ;;  %s45_s21 = int_to_ptr.vmem [resolvable:$true] %s44_s21  ;;  %s3762_s23 = int_to_ptr.vmem [resolvable:$true] %s53_s23 }
  0x27   :  { %s3619_s26 = scalar_lea.hbm %s3943_s2, 320 }
  0x28   :  { %p3620_p2 = scmp.ne.s32.totalorder %s3943_s2, %s3619_s26  ;;  %p3623_p3 = scmp.lt.u32.totalorder %s3619_s26, %s3943_s2 }
  0x2a   :  { %p3625_p4 = pnand %p3623_p3, %p3620_p2 }
  0x2c   :  { %3628 = shalt.err (!%p3625_p4)
}
  0x2d   :  { %s3629_s0 = scalar_lea.vmem %s45_s21, 320  ;;  %p3634_p6 = scmp.lt.s32.totalorder %s45_s21, %s45_s21 }
  0x2e   :  { %p3630_p5 = scmp.ne.s32.totalorder %s45_s21, %s3629_s0  ;;  %p3635_p7 = scmp.lt.s32.totalorder %s3629_s0, %s3629_s0 }
  0x30   :  { %p3636_p8 = por %p3635_p7, %p3634_p6 }
  0x32   :  { %p3637_p9 = pnand %p3636_p8, %p3630_p5 }
  0x34   :  { %3640 = shalt.err (!%p3637_p9)
}
  0x35   :  { %47 = dma.hbm_to_vmem [thread:$0]  %s3943_s2, 320, %s45_s21, [#allocation7]  }
  0x36   :  { %s3641_s10 = scalar_lea.hbm %s3944_s3, 20480 }
  0x37   :  { %p3642_p10 = scmp.ne.s32.totalorder %s3944_s3, %s3641_s10  ;;  %p3645_p11 = scmp.lt.u32.totalorder %s3641_s10, %s3944_s3 }
  0x39   :  { %p3647_p12 = pnand %p3645_p11, %p3642_p10 }
  0x3b   :  { %3650 = shalt.err (!%p3647_p12)
}
  0x3c   :  { %s3651_s15 = scalar_lea.vmem %s3762_s23, 20480  ;;  %p3656_p0 = scmp.lt.s32.totalorder %s3762_s23, %s3762_s23 }
  0x3d   :  { %p3652_p13 = scmp.ne.s32.totalorder %s3762_s23, %s3651_s15  ;;  %p3657_p1 = scmp.lt.s32.totalorder %s3651_s15, %s3651_s15 }
  0x3f   :  { %p3658_p2 = por %p3657_p1, %p3656_p0 }
  0x41   :  { %p3659_p3 = pnand %p3658_p2, %p3652_p13 }
  0x43   :  { %3662 = shalt.err (!%p3659_p3)
}
  0x44   :  { %59 = dma.hbm_to_vmem [thread:$0]  %s3944_s3, 20480, %s3762_s23, [#allocation10], %s3697_s1, %s3697_s1, %s3698_s17  }
  0x45   :  { %3685 = dma.done.wait [#allocation4], 128  }
  0x46   :  { %3686 = vsyncadd [#allocation4], 4294967168 }
  0x47   :  { %3687 = dma.done.wait [#allocation7], 5440  }
  0x48   :  { %3688 = vsyncadd [#allocation7], 4294961856 }
  0x49   :  { %3689 = dma.done.wait [#allocation10], 20480  }
  0x4a   :  { %3690 = vsyncadd [#allocation10], 4294946816  ;;  %v3701_v0 = vmov 0   ;;  %v3346_v1 = vld [vmem:[#allocation6 + $0x4] ss:$80 sps:$4 sm:$0xff]   ;;  %v3798_v9 = vld [vmem:[#allocation3] sm:$0xff]  }
  0x4b   :  { %442 = vmatprep.mubr.bf16.mxu0 %v3701_v0  ;;  %485 = vmatprep.mubr.bf16.mxu1 %v3701_v0  ;;  %v3348_v2 = vld [vmem:[#allocation6 + $0xc] ss:$80 sps:$4 sm:$0xff]   ;;  %v3350_v3 = vld [vmem:[#allocation6] ss:$80 sps:$4 sm:$0xff]   ;;  %v3351_v4 = vld [vmem:[#allocation6 + $0x8] ss:$80 sps:$4 sm:$0xff]  }
  0x4c   :  { %410 = vmatprep.subr.bf16.mxu0 %v3346_v1  ;;  %453 = vmatprep.subr.bf16.mxu1 %v3348_v2  ;;  %v3352_v5 = vld [vmem:[#allocation6 + $0xa4] ss:$80 sps:$4 sm:$0xff]   ;;  %v3354_v6 = vld [vmem:[#allocation6 + $0xac] ss:$80 sps:$4 sm:$0xff]   ;;  %v3356_v7 = vld [vmem:[#allocation6 + $0xa0] ss:$80 sps:$4 sm:$0xff]  }
  0x4d   :  { %411 = vmatpush1.bf16.msra.mxu0 %v3350_v3  ;;  %454 = vmatpush1.bf16.msra.mxu1 %v3351_v4  ;;  %v3357_v8 = vld [vmem:[#allocation6 + $0xa8] ss:$80 sps:$4 sm:$0xff]   ;;  %v3359_v10 = vld [vmem:[#allocation6 + $0x10] ss:$80 sps:$4 sm:$0xff]   ;;  %v3361_v11 = vld [vmem:[#allocation6 + $0x14] ss:$80 sps:$4 sm:$0xff]  }
  0x4e   :  { %412 = vmatprep.subr.bf16.mxu0 %v3352_v5  ;;  %455 = vmatprep.subr.bf16.mxu1 %v3354_v6  ;;  %vm406_vm0 = vcmask 261120   ;;  %v3362_v12 = vld [vmem:[#allocation6 + $0x18] ss:$80 sps:$4 sm:$0xff]   ;;  %v3364_v13 = vld [vmem:[#allocation6 + $0x1c] ss:$80 sps:$4 sm:$0xff]   ;;  %vm2880_vm1 = vcmask 7168  }
  0x4f   :  { %v3367_v14 = vld [vmem:[#allocation6 + $0xb4] ss:$80 sps:$4 sm:$0xff]   ;;  %v3370_v15 = vld [vmem:[#allocation6 + $0xbc] ss:$80 sps:$4 sm:$0xff]   ;;  %v3365_v16 = vld [vmem:[#allocation6 + $0xb0] ss:$80 sps:$4 sm:$0xff]  }
  0x50   :  { %v3368_v17 = vld [vmem:[#allocation6 + $0xb8] ss:$80 sps:$4 sm:$0xff]   ;;  %v3373_v18 = vld [vmem:[#allocation6 + $0x24] ss:$80 sps:$4 sm:$0xff]   ;;  %v3376_v19 = vld [vmem:[#allocation6 + $0x2c] ss:$80 sps:$4 sm:$0xff]  }
  0x51   :  { %413 = vmatpush1.bf16.msra.mxu0 %v3356_v7  ;;  %456 = vmatpush1.bf16.msra.mxu1 %v3357_v8  ;;  %v3371_v20 = vld [vmem:[#allocation6 + $0x20] ss:$80 sps:$4 sm:$0xff]   ;;  %v3374_v21 = vld [vmem:[#allocation6 + $0x28] ss:$80 sps:$4 sm:$0xff]   ;;  %v3379_v22 = vld [vmem:[#allocation6 + $0xc4] ss:$80 sps:$4 sm:$0xff]  }
  0x52   :  { %496 = vmatprep.subr.bf16.mxu0 %v3361_v11  ;;  %539 = vmatprep.subr.bf16.mxu1 %v3364_v13  ;;  %v3382_v23 = vld [vmem:[#allocation6 + $0xcc] ss:$80 sps:$4 sm:$0xff]   ;;  %v3377_v24 = vld [vmem:[#allocation6 + $0xc0] ss:$80 sps:$4 sm:$0xff]   ;;  %v3380_v25 = vld [vmem:[#allocation6 + $0xc8] ss:$80 sps:$4 sm:$0xff]  }
  0x53   :  { %v3385_v26 = vld [vmem:[#allocation6 + $0x34] ss:$80 sps:$4 sm:$0xff]   ;;  %v3388_v27 = vld [vmem:[#allocation6 + $0x3c] ss:$80 sps:$4 sm:$0xff]   ;;  %v3383_v28 = vld [vmem:[#allocation6 + $0x30] ss:$80 sps:$4 sm:$0xff]  }
  0x54   :  { %2943 = vmatmul.mubr.msk.bf16.vlgmr.msra.gmra.mrb[0].mxu0 %vm406_vm0, %v3798_v9  ;;  %2944 = vmatmul.mubr.msk.bf16.vlgmr.msra.gmra.mrb[0].mxu1 %vm406_vm0, %v3798_v9  ;;  %v3386_v29 = vld [vmem:[#allocation6 + $0x38] ss:$80 sps:$4 sm:$0xff]   ;;  %v3391_v30 = vld [vmem:[#allocation6 + $0xd4] ss:$80 sps:$4 sm:$0xff]   ;;  %v3394_v31 = vld [vmem:[#allocation6 + $0xdc] ss:$80 sps:$4 sm:$0xff]  }
  0x55   :  { %497 = vmatpush1.bf16.msra.mxu0 %v3359_v10  ;;  %540 = vmatpush1.bf16.msra.mxu1 %v3362_v12  ;;  %v3389_v32 = vld [vmem:[#allocation6 + $0xd0] ss:$80 sps:$4 sm:$0xff]   ;;  %v3392_v33 = vld [vmem:[#allocation6 + $0xd8] ss:$80 sps:$4 sm:$0xff]   ;;  %v3397_v34 = vld [vmem:[#allocation6 + $0x44] ss:$80 sps:$4 sm:$0xff]   ;;  %v969_v12 = vlaneseq }
  0x56   :  { %498 = vmatprep.subr.bf16.mxu0 %v3367_v14  ;;  %541 = vmatprep.subr.bf16.mxu1 %v3370_v15  ;;  %v3400_v35 = vld [vmem:[#allocation6 + $0x4c] ss:$80 sps:$4 sm:$0xff]   ;;  %v3395_v36 = vld [vmem:[#allocation6 + $0x40] ss:$80 sps:$4 sm:$0xff]   ;;  %v3398_v37 = vld [vmem:[#allocation6 + $0x48] ss:$80 sps:$4 sm:$0xff]  }
  0x57   :  { %528 = vmatprep.mubr.bf16.mxu0 %v3701_v0  ;;  %571 = vmatprep.mubr.bf16.mxu1 %v3701_v0  ;;  %v3403_v38 = vld [vmem:[#allocation6 + $0xe4] ss:$80 sps:$4 sm:$0xff]   ;;  %v3406_v39 = vld [vmem:[#allocation6 + $0xec] ss:$80 sps:$4 sm:$0xff]   ;;  %v3401_v40 = vld [vmem:[#allocation6 + $0xe0] ss:$80 sps:$4 sm:$0xff]  }
  0x58   :  { %v3404_v41 = vld [vmem:[#allocation6 + $0xe8] ss:$80 sps:$4 sm:$0xff]   ;;  %v3411_v46 = vld [vmem:[#allocation9 + $0x48] sm:$0xff]   ;;  %v3419_v54 = vld [vmem:[#allocation9 + $0x58] sm:$0xff]   ;;  %v3828_v13 = vshrl.u32 %v969_v12, 7 }
  0x59   :  { %499 = vmatpush1.bf16.msra.mxu0 %v3365_v16  ;;  %542 = vmatpush1.bf16.msra.mxu1 %v3368_v17  ;;  %v3407_v42 = vld [vmem:[#allocation9 + $0x40] sm:$0xff]   ;;  %v3412_v47 = vld [vmem:[#allocation9 + $0xc8] sm:$0xff]   ;;  %v3415_v50 = vld [vmem:[#allocation9 + $0x50] sm:$0xff]  }
  0x5a   :  { %582 = vmatprep.subr.bf16.mxu0 %v3373_v18  ;;  %625 = vmatprep.subr.bf16.mxu1 %v3376_v19  ;;  %v3408_v43 = vld [vmem:[#allocation9 + $0xc0] sm:$0xff]   ;;  %v3413_v48 = vld [vmem:[#allocation9 + $0x8] sm:$0xff]   ;;  %v3416_v51 = vld [vmem:[#allocation9 + $0xd0] sm:$0xff]   ;;  %v3831_v14 = vsub.s32 0, %v3828_v13  ;;  %v3834_v15 = vsub.s32 2, %v3828_v13  ;;  %v3837_v17 = vsub.s32 1, %v3828_v13 }
  0x5b   :  { %v3409_v44 = vld [vmem:[#allocation9] sm:$0xff]   ;;  %v3414_v49 = vld [vmem:[#allocation9 + $0x88] sm:$0xff]   ;;  %v3417_v52 = vld [vmem:[#allocation9 + $0x10] sm:$0xff]   ;;  %v3840_v18 = vsub.s32 3, %v3828_v13 }
  0x5c   :  { %2945 = vmatmul.mubr.msk.bf16.vlgmr.msra.gmra.mrb[4].mxu0 %vm406_vm0, %v3798_v9  ;;  %2946 = vmatmul.mubr.msk.bf16.vlgmr.msra.gmra.mrb[4].mxu1 %vm406_vm0, %v3798_v9  ;;  %v3410_v45 = vld [vmem:[#allocation9 + $0x80] sm:$0xff]   ;;  %v3418_v53 = vld [vmem:[#allocation9 + $0x90] sm:$0xff]   ;;  %v3420_v55 = vld [vmem:[#allocation9 + $0xd8] sm:$0xff]  }
  0x5d   :  { %583 = vmatpush1.bf16.msra.mxu0 %v3371_v20  ;;  %626 = vmatpush1.bf16.msra.mxu1 %v3374_v21  ;;  %v3421_v56 = vld [vmem:[#allocation9 + $0x18] sm:$0xff]   ;;  %v3423_v58 = vld [vmem:[#allocation9 + $0x60] sm:$0xff]   ;;  %v3427_v62 = vld [vmem:[#allocation9 + $0x68] sm:$0xff]  }
  0x5e   :  { %584 = vmatprep.subr.bf16.mxu0 %v3379_v22  ;;  %627 = vmatprep.subr.bf16.mxu1 %v3382_v23  ;;  %v3422_v57 = vld [vmem:[#allocation9 + $0x98] sm:$0xff]   ;;  %v3424_v59 = vld [vmem:[#allocation9 + $0xe0] sm:$0xff]   ;;  %v3428_v63 = vld [vmem:[#allocation9 + $0xe8] sm:$0xff]   ;;  %v987_v23 = vsub.s32 4, %v3828_v13 }
  0x5f   :  { %614 = vmatprep.mubr.bf16.mxu0 %v3701_v0  ;;  %657 = vmatprep.mubr.bf16.mxu1 %v3701_v0  ;;  %v3425_v60 = vld [vmem:[#allocation9 + $0x20] sm:$0xff]   ;;  %v3430_v1 = vld [vmem:[#allocation9 + $0xa8] sm:$0xff]   ;;  %v3431_v2 = vld [vmem:[#allocation9 + $0x70] sm:$0xff]  }
  0x60   :  { %v3426_v61 = vld [vmem:[#allocation9 + $0xa0] sm:$0xff]   ;;  %v3432_v3 = vld [vmem:[#allocation9 + $0xf0] sm:$0xff]   ;;  %v3435_v6 = vld [vmem:[#allocation9 + $0x78] sm:$0xff]  }
  0x61   :  { %585 = vmatpush1.bf16.msra.mxu0 %v3377_v24  ;;  %628 = vmatpush1.bf16.msra.mxu1 %v3380_v25  ;;  %v3433_v4 = vld [vmem:[#allocation9 + $0x30] sm:$0xff]   ;;  %v3436_v7 = vld [vmem:[#allocation9 + $0xf8] sm:$0xff]   ;;  %v3439_v10 = vld [vmem:[#allocation9 + $0x140] sm:$0xff]  }
  0x62   :  { %668 = vmatprep.subr.bf16.mxu0 %v3385_v26  ;;  %711 = vmatprep.subr.bf16.mxu1 %v3388_v27  ;;  %v3434_v5 = vld [vmem:[#allocation9 + $0xb0] sm:$0xff]   ;;  %v3437_v8 = vld [vmem:[#allocation9 + $0x38] sm:$0xff]   ;;  %v3440_v11 = vld [vmem:[#allocation9 + $0x1c0] sm:$0xff]   ;;  %v991_v26 = vsub.s32 5, %v3828_v13 }
  0x63   :  { %v963_v16 = vld [vmem:[#allocation8] sm:$0xff] }
  0x64   :  { %2947 = vmatmul.mubr.msk.bf16.vlgmr.msra.gmra.mrb[8].mxu0 %vm406_vm0, %v3798_v9  ;;  %2948 = vmatmul.mubr.msk.bf16.vlgmr.msra.gmra.mrb[8].mxu1 %vm406_vm0, %v3798_v9  ;;  %v972_v19 = vrot.slane %v963_v16, %v3831_v14  ;;  %v980_v20 = vrot.slane %v963_v16, %v3834_v15  ;;  %v976_v21 = vrot.slane %v963_v16, %v3837_v17 }
  0x65   :  { %669 = vmatpush1.bf16.msra.mxu0 %v3383_v28  ;;  %712 = vmatpush1.bf16.msra.mxu1 %v3386_v29  ;;  %v984_v22 = vrot.slane %v963_v16, %v3840_v18 }
  0x66   :  { %670 = vmatprep.subr.bf16.mxu0 %v3391_v30  ;;  %713 = vmatprep.subr.bf16.mxu1 %v3394_v31  ;;  %v995_v31 = vsub.s32 6, %v3828_v13 }
  0x67   :  { %700 = vmatprep.mubr.bf16.mxu0 %v3701_v0  ;;  %743 = vmatprep.mubr.bf16.mxu1 %v3701_v0 }
  0x69   :  { %671 = vmatpush1.bf16.msra.mxu0 %v3389_v32  ;;  %714 = vmatpush1.bf16.msra.mxu1 %v3392_v33 }
  0x6a   :  { %754 = vmatprep.subr.bf16.mxu0 %v3397_v34  ;;  %797 = vmatprep.subr.bf16.mxu1 %v3400_v35 }
  0x6c   :  { %2949 = vmatmul.mubr.msk.bf16.vlgmr.msra.gmra.mrb[12].mxu0 %vm406_vm0, %v3798_v9  ;;  %2950 = vmatmul.mubr.msk.bf16.vlgmr.msra.gmra.mrb[12].mxu1 %vm406_vm0, %v3798_v9 }
  0x6d   :  { %755 = vmatpush1.bf16.msra.mxu0 %v3395_v36  ;;  %798 = vmatpush1.bf16.msra.mxu1 %v3398_v37  ;;  %v999_v36 = vsub.s32 7, %v3828_v13  ;;  %v3460_v13 = vld [vmem:[#allocation9 + $0x1e8] sm:$0xff]  }
  0x6e   :  { %756 = vmatprep.subr.bf16.mxu0 %v3403_v38  ;;  %799 = vmatprep.subr.bf16.mxu1 %v3406_v39 }
  0x6f   :  { %786 = vmatprep.mubr.bf16.mxu0 %v3701_v0  ;;  %829 = vmatprep.mubr.bf16.mxu1 %v3701_v0  ;;  %v3429_v0 = vld [vmem:[#allocation9 + $0x28] sm:$0xff]  }
  0x71   :  { %757 = vmatpush1.bf16.msra.mxu0 %v3401_v40  ;;  %800 = vmatpush1.bf16.msra.mxu1 %v3404_v41 }
  0x72   :  { %3114 = vmatprep.subr.bf16.mxu0 %v3407_v42  ;;  %3136 = vmatprep.subr.bf16.mxu1 %v3408_v43  ;;  %v988_v42 = vrot.slane %v963_v16, %v987_v23 }
  0x74   :  { %2951 = vmatmul.mubr.msk.bf16.vlgmr.msra.gmra.mrb[16].mxu0 %vm406_vm0, %v3798_v9  ;;  %2952 = vmatmul.mubr.msk.bf16.vlgmr.msra.gmra.mrb[16].mxu1 %vm406_vm0, %v3798_v9  ;;  %v3438_v9 = vld [vmem:[#allocation9 + $0xb8] sm:$0xff]  }
  0x75   :  { %3115 = vmatpush3.bf16.msra.mxu0 %v3409_v44  ;;  %3137 = vmatpush3.bf16.msra.mxu1 %v3410_v45 }
  0x76   :  { %3116 = vmatprep.subr.bf16.mxu0 %v3411_v46  ;;  %3138 = vmatprep.subr.bf16.mxu1 %v3412_v47  ;;  %v992_v46 = vrot.slane %v963_v16, %v991_v26 }
  0x79   :  { %3117 = vmatpush3.bf16.msra.mxu0 %v3413_v48  ;;  %3139 = vmatpush3.bf16.msra.mxu1 %v3414_v49 }
  0x7a   :  { %3118 = vmatprep.subr.bf16.mxu0 %v3415_v50  ;;  %3140 = vmatprep.subr.bf16.mxu1 %v3416_v51  ;;  %v996_v50 = vrot.slane %v963_v16, %v995_v31 }
  0x7d   :  { %3119 = vmatpush3.bf16.msra.mxu0 %v3417_v52  ;;  %3141 = vmatpush3.bf16.msra.mxu1 %v3418_v53 }
  0x7e   :  { %3120 = vmatprep.subr.bf16.mxu0 %v3419_v54  ;;  %3142 = vmatprep.subr.bf16.mxu1 %v3420_v55  ;;  %v1000_v54 = vrot.slane %v963_v16, %v999_v36 }
  0x81   :  { %3121 = vmatpush3.bf16.msra.mxu0 %v3421_v56  ;;  %3143 = vmatpush3.bf16.msra.mxu1 %v3422_v57 }
  0x82   :  { %3122 = vmatprep.subr.bf16.mxu0 %v3423_v58  ;;  %3144 = vmatprep.subr.bf16.mxu1 %v3424_v59  ;;  %v3441_v59 = vld [vmem:[#allocation9 + $0x100] sm:$0xff]  }
  0x85   :  { %3123 = vmatpush3.bf16.msra.mxu0 %v3425_v60  ;;  %3145 = vmatpush3.bf16.msra.mxu1 %v3426_v61  ;;  %v3442_v60 = vld [vmem:[#allocation9 + $0x180] sm:$0xff]  }
  0x86   :  { %3124 = vmatprep.subr.bf16.mxu0 %v3427_v62  ;;  %3146 = vmatprep.subr.bf16.mxu1 %v3428_v63  ;;  %v3443_v63 = vld [vmem:[#allocation9 + $0x148] sm:$0xff]  }
  0x89   :  { %3125 = vmatpush3.bf16.msra.mxu0 %v3429_v0  ;;  %3147 = vmatpush3.bf16.msra.mxu1 %v3430_v1  ;;  %v3444_v0 = vld [vmem:[#allocation9 + $0x1c8] sm:$0xff]  }
  0x8a   :  { %3126 = vmatprep.subr.bf16.mxu0 %v3431_v2  ;;  %3148 = vmatprep.subr.bf16.mxu1 %v3432_v3 }
  0x8d   :  { %3127 = vmatpush3.bf16.msra.mxu0 %v3433_v4  ;;  %3149 = vmatpush3.bf16.msra.mxu1 %v3434_v5 }
  0x8e   :  { %3128 = vmatprep.subr.bf16.mxu0 %v3435_v6  ;;  %3150 = vmatprep.subr.bf16.mxu1 %v3436_v7 }
  0x91   :  { %3129 = vmatpush3.bf16.msra.mxu0 %v3437_v8  ;;  %3151 = vmatpush3.bf16.msra.mxu1 %v3438_v9  ;;  %v3858_v9 = vld [vmem:[#allocation8 + $0x8] sm:$0xff] }
  0x92   :  { %3158 = vmatprep.subr.bf16.mxu0 %v3439_v10  ;;  %3180 = vmatprep.subr.bf16.mxu1 %v3440_v11 }
 0x127   :  { %v444_v24 = vpop.f32.mrb[0].mxu0  ;;  %v487_v25 = vpop.f32.mrb[0].mxu1 }
 0x128   :  { %v1069_v27 = vadd.f32 %v972_v19, %v444_v24  ;;  %v1071_v28 = vadd.f32 %v980_v20, %v487_v25  ;;  %v446_v29 = vpop.f32.mrb[1].mxu0  ;;  %v489_v30 = vpop.f32.mrb[1].mxu1 }
 0x129   :  { %v1070_v32 = vadd.f32 %v976_v21, %v446_v29  ;;  %v1072_v33 = vadd.f32 %v984_v22, %v489_v30  ;;  %v448_v34 = vpop.f32.mrb[2].mxu0  ;;  %v491_v35 = vpop.f32.mrb[2].mxu1  ;;  %v3447_v29 = vld [vmem:[#allocation9 + $0x150] sm:$0xff]  }
 0x12a   :  { %v1111_v37 = vmax.f32 %v1071_v28, 0.0  ;;  %v1089_v38 = vadd.f32 %v972_v19, %v448_v34  ;;  %v1091_v39 = vadd.f32 %v980_v20, %v491_v35  ;;  %v450_v40 = vpop.f32.mrb[3].mxu0  ;;  %v493_v41 = vpop.f32.mrb[3].mxu1  ;;  %v1109_v47 = vmax.f32 %v1069_v27, 0.0  ;;  %v3448_v30 = vld [vmem:[#allocation9 + $0x1d0] sm:$0xff]  }
 0x12b   :  { %v1112_v43 = vmax.f32 %v1072_v33, 0.0  ;;  %v1090_v44 = vadd.f32 %v976_v21, %v450_v40  ;;  %v1092_v45 = vadd.f32 %v984_v22, %v493_v41  ;;  %v1110_v51 = vmax.f32 %v1070_v32, 0.0  ;;  %v3445_v21 = vld [vmem:[#allocation9 + $0x108] sm:$0xff]  }
 0x12c   :  { %v1129_v48 = vmax.f32 %v1089_v38, 0.0  ;;  %v1131_v49 = vmax.f32 %v1091_v39, 0.0  ;;  %v3446_v22 = vld [vmem:[#allocation9 + $0x188] sm:$0xff]   ;;  %v1004_v34 = vrot.slane %v3858_v9, %v3831_v14  ;;  %v1012_v35 = vrot.slane %v3858_v9, %v3834_v15 }
 0x12d   :  { %v1130_v52 = vmax.f32 %v1090_v44, 0.0  ;;  %v1132_v53 = vmax.f32 %v1092_v45, 0.0  ;;  %v1008_v39 = vrot.slane %v3858_v9, %v3837_v17  ;;  %v1016_v40 = vrot.slane %v3858_v9, %v3840_v18  ;;  %v3450_v44 = vld [vmem:[#allocation9 + $0x190] sm:$0xff]  }
 0x12e   :  { %v1149_v55 = vpack.c.bf16 %v1129_v48, %v1109_v47  ;;  %v1151_v56 = vpack.c.bf16 %v1131_v49, %v1111_v37  ;;  %v3451_v49 = vld [vmem:[#allocation9 + $0x158] sm:$0xff]  }
 0x12f   :  { %v1150_v57 = vpack.c.bf16 %v1130_v52, %v1110_v51  ;;  %v1152_v58 = vpack.c.bf16 %v1132_v53, %v1112_v43  ;;  %v530_v61 = vpop.f32.mrb[4].mxu0  ;;  %v573_v62 = vpop.f32.mrb[4].mxu1  ;;  %v3449_v43 = vld [vmem:[#allocation9 + $0x110] sm:$0xff]  }
 0x130   :  { %v1073_v1 = vadd.f32 %v988_v42, %v530_v61  ;;  %v532_v2 = vpop.f32.mrb[5].mxu0  ;;  %v1075_v3 = vadd.f32 %v996_v50, %v573_v62  ;;  %v575_v4 = vpop.f32.mrb[5].mxu1 }
 0x131   :  { %2488 = vmatprep.mubr.bf16.mxu0 %v1150_v57  ;;  %2529 = vmatprep.mubr.bf16.mxu1 %v1152_v58  ;;  %v1074_v5 = vadd.f32 %v992_v46, %v532_v2  ;;  %v534_v6 = vpop.f32.mrb[6].mxu0  ;;  %v1076_v7 = vadd.f32 %v1000_v54, %v575_v4  ;;  %v577_v8 = vpop.f32.mrb[6].mxu1  ;;  %v3454_v2 = vld [vmem:[#allocation9 + $0x198] sm:$0xff]  }
 0x132   :  { %2489 = vmatmul.mubr.bf16.vlgmr.msra.gmra.mrb[20].mxu0 %v1149_v55  ;;  %2530 = vmatmul.mubr.bf16.vlgmr.msra.gmra.mrb[20].mxu1 %v1151_v56  ;;  %v1113_v10 = vmax.f32 %v1073_v1, 0.0  ;;  %v1093_v11 = vadd.f32 %v988_v42, %v534_v6  ;;  %v1115_v12 = vmax.f32 %v1075_v3, 0.0  ;;  %v536_v16 = vpop.f32.mrb[7].mxu0  ;;  %v1095_v19 = vadd.f32 %v996_v50, %v577_v8  ;;  %v579_v20 = vpop.f32.mrb[7].mxu1  ;;  %v3452_v50 = vld [vmem:[#allocation9 + $0x1d8] sm:$0xff]   ;;  %v3456_v8 = vld [vmem:[#allocation9 + $0x1e0] sm:$0xff]  }
 0x133   :  { %3159 = vmatpush3.bf16.msra.mxu0 %v3441_v59  ;;  %3181 = vmatpush3.bf16.msra.mxu1 %v3442_v60  ;;  %v1114_v24 = vmax.f32 %v1074_v5, 0.0  ;;  %v1094_v25 = vadd.f32 %v992_v46, %v536_v16  ;;  %v1116_v27 = vmax.f32 %v1076_v7, 0.0  ;;  %v1096_v28 = vadd.f32 %v1000_v54, %v579_v20  ;;  %v3453_v1 = vld [vmem:[#allocation9 + $0x118] sm:$0xff]   ;;  %v3455_v7 = vld [vmem:[#allocation9 + $0x160] sm:$0xff]  }
 0x134   :  { %3160 = vmatprep.subr.bf16.mxu0 %v3443_v63  ;;  %3182 = vmatprep.subr.bf16.mxu1 %v3444_v0  ;;  %v1133_v32 = vmax.f32 %v1093_v11, 0.0  ;;  %v1135_v33 = vmax.f32 %v1095_v19, 0.0  ;;  %v1028_v16 = vrot.slane %v3858_v9, %v995_v31 }
 0x135   :  { %v1134_v37 = vmax.f32 %v1094_v25, 0.0  ;;  %v1136_v38 = vmax.f32 %v1096_v28, 0.0 }
 0x136   :  { %v3868_v41 = vpack.c.bf16 %v1133_v32, %v1113_v10  ;;  %v3870_v42 = vpack.c.bf16 %v1135_v33, %v1115_v12  ;;  %v1020_v12 = vrot.slane %v3858_v9, %v987_v23  ;;  %v3457_v23 = vld [vmem:[#allocation9 + $0x120] sm:$0xff]  }
 0x137   :  { %3161 = vmatpush3.bf16.msra.mxu0 %v3445_v21  ;;  %3183 = vmatpush3.bf16.msra.mxu1 %v3446_v22  ;;  %v1154_v45 = vpack.c.bf16 %v1134_v37, %v1114_v24  ;;  %v1156_v46 = vpack.c.bf16 %v1136_v38, %v1116_v27  ;;  %v616_v47 = vpop.f32.mrb[8].mxu0  ;;  %v659_v48 = vpop.f32.mrb[8].mxu1  ;;  %v1024_v21 = vrot.slane %v3858_v9, %v991_v26  ;;  %v3458_v27 = vld [vmem:[#allocation9 + $0x1a0] sm:$0xff]   ;;  %v3459_v26 = vld [vmem:[#allocation9 + $0x168] sm:$0xff]  }
 0x138   :  { %3162 = vmatprep.subr.bf16.mxu0 %v3447_v29  ;;  %3184 = vmatprep.subr.bf16.mxu1 %v3448_v30  ;;  %v1077_v51 = vadd.f32 %v1004_v34, %v616_v47  ;;  %v618_v52 = vpop.f32.mrb[9].mxu0  ;;  %v1079_v53 = vadd.f32 %v1012_v35, %v659_v48  ;;  %v661_v54 = vpop.f32.mrb[9].mxu1  ;;  %v1032_v22 = vrot.slane %v3858_v9, %v999_v36  ;;  %v3461_v48 = vld [vmem:[#allocation9 + $0x128] sm:$0xff]  }
 0x139   :  { %2570 = vmatprep.mubr.bf16.mxu0 %v1154_v45  ;;  %2611 = vmatprep.mubr.bf16.mxu1 %v1156_v46  ;;  %v1078_v55 = vadd.f32 %v1008_v39, %v618_v52  ;;  %v620_v56 = vpop.f32.mrb[10].mxu0  ;;  %v1080_v57 = vadd.f32 %v1016_v40, %v661_v54  ;;  %v663_v58 = vpop.f32.mrb[10].mxu1  ;;  %v3463_v54 = vld [vmem:[#allocation9 + $0x170] sm:$0xff]  }
 0x13a   :  { %v1117_v59 = vmax.f32 %v1077_v51, 0.0  ;;  %v1097_v60 = vadd.f32 %v1004_v34, %v620_v56  ;;  %v1119_v61 = vmax.f32 %v1079_v53, 0.0  ;;  %v622_v62 = vpop.f32.mrb[11].mxu0  ;;  %v1099_v63 = vadd.f32 %v1012_v35, %v663_v58  ;;  %v665_v0 = vpop.f32.mrb[11].mxu1 }
 0x13b   :  { %3163 = vmatpush3.bf16.msra.mxu0 %v3449_v43  ;;  %3185 = vmatpush3.bf16.msra.mxu1 %v3450_v44  ;;  %v1118_v3 = vmax.f32 %v1078_v55, 0.0  ;;  %v1098_v4 = vadd.f32 %v1008_v39, %v622_v62  ;;  %v1120_v5 = vmax.f32 %v1080_v57, 0.0  ;;  %v1100_v6 = vadd.f32 %v1016_v40, %v665_v0  ;;  %v965_v39 = vld [vmem:[#allocation8 + $0x10] sm:$0xf]  ;;  %v3464_v55 = vld [vmem:[#allocation9 + $0x1f0] sm:$0xff]  }
 0x13c   :  { %3164 = vmatprep.subr.bf16.mxu0 %v3451_v49  ;;  %3186 = vmatprep.subr.bf16.mxu1 %v3452_v50  ;;  %v1137_v10 = vmax.f32 %v1097_v60, 0.0  ;;  %v1139_v11 = vmax.f32 %v1099_v63, 0.0  ;;  %v3462_v49 = vld [vmem:[#allocation9 + $0x1a8] sm:$0xff]   ;;  %v1036_v58 = vrot.slane %v965_v39, %v3831_v14  ;;  %v1040_v62 = vrot.slane %v965_v39, %v3837_v17  ;;  %v3468_v17 = vld [vmem:[#allocation9 + $0x1f8] sm:$0xff]  }
 0x13d   :  { %v1138_v19 = vmax.f32 %v1098_v4, 0.0  ;;  %v1140_v20 = vmax.f32 %v1100_v6, 0.0  ;;  %v1048_v63 = vrot.slane %v965_v39, %v3840_v18  ;;  %v3467_v6 = vld [vmem:[#allocation9 + $0x178] sm:$0xff]  }
 0x13e   :  { %v3884_v24 = vpack.c.bf16 %v1137_v10, %v1117_v59  ;;  %v3886_v25 = vpack.c.bf16 %v1139_v11, %v1119_v61  ;;  %v1044_v59 = vrot.slane %v965_v39, %v3834_v15 }
 0x13f   :  { %3165 = vmatpush3.bf16.msra.mxu0 %v3453_v1  ;;  %3187 = vmatpush3.bf16.msra.mxu1 %v3454_v2  ;;  %v3888_v28 = vpack.c.bf16 %v1138_v19, %v1118_v3  ;;  %v3890_v31 = vpack.c.bf16 %v1140_v20, %v1120_v5  ;;  %v702_v29 = vpop.f32.mrb[12].mxu0  ;;  %v745_v30 = vpop.f32.mrb[12].mxu1  ;;  %v3465_v2 = vld [vmem:[#allocation9 + $0x130] sm:$0xff]  }
 0x140   :  { %3166 = vmatprep.subr.bf16.mxu0 %v3455_v7  ;;  %3188 = vmatprep.subr.bf16.mxu1 %v3456_v8  ;;  %v1081_v32 = vadd.f32 %v1020_v12, %v702_v29  ;;  %v704_v36 = vpop.f32.mrb[13].mxu0  ;;  %v1083_v9 = vadd.f32 %v1028_v16, %v745_v30  ;;  %v747_v33 = vpop.f32.mrb[13].mxu1  ;;  %v3466_v3 = vld [vmem:[#allocation9 + $0x1b0] sm:$0xff]   ;;  %v3469_v30 = vld [vmem:[#allocation9 + $0x138] sm:$0xff]  }
 0x141   :  { %v1082_v34 = vadd.f32 %v1024_v21, %v704_v36  ;;  %v706_v35 = vpop.f32.mrb[14].mxu0  ;;  %v1084_v37 = vadd.f32 %v1032_v22, %v747_v33  ;;  %v749_v38 = vpop.f32.mrb[14].mxu1  ;;  %v3471_v33 = vld [vmem:[#allocation9 + $0x240] sm:$0xff]  }
 0x142   :  { %v1121_v40 = vmax.f32 %v1081_v32, 0.0  ;;  %v1101_v43 = vadd.f32 %v1020_v12, %v706_v35  ;;  %v1123_v44 = vmax.f32 %v1083_v9, 0.0  ;;  %v708_v45 = vpop.f32.mrb[15].mxu0  ;;  %v1103_v46 = vadd.f32 %v1028_v16, %v749_v38  ;;  %v751_v47 = vpop.f32.mrb[15].mxu1 }
 0x143   :  { %3167 = vmatpush3.bf16.msra.mxu0 %v3457_v23  ;;  %3189 = vmatpush3.bf16.msra.mxu1 %v3458_v27  ;;  %v1122_v50 = vmax.f32 %v1082_v34, 0.0  ;;  %v1102_v51 = vadd.f32 %v1024_v21, %v708_v45  ;;  %v1124_v52 = vmax.f32 %v1084_v37, 0.0  ;;  %v1104_v53 = vadd.f32 %v1032_v22, %v751_v47  ;;  %v3472_v34 = vld [vmem:[#allocation9 + $0x2c0] sm:$0xff]  }
 0x144   :  { %3168 = vmatprep.subr.bf16.mxu0 %v3459_v26  ;;  %3190 = vmatprep.subr.bf16.mxu1 %v3460_v13  ;;  %v1141_v56 = vmax.f32 %v1101_v43, 0.0  ;;  %v1143_v57 = vmax.f32 %v1103_v46, 0.0  ;;  %v3470_v26 = vld [vmem:[#allocation9 + $0x1b8] sm:$0xff]   ;;  %v3474_v45 = vld [vmem:[#allocation9 + $0x280] sm:$0xff]  }
 0x145   :  { %v1142_v60 = vmax.f32 %v1102_v51, 0.0  ;;  %v1144_v61 = vmax.f32 %v1104_v53, 0.0  ;;  %v3478_v51 = vld [vmem:[#allocation9 + $0x288] sm:$0xff]   ;;  %v3480_v53 = vld [vmem:[#allocation9 + $0x2d0] sm:$0xff]  }
 0x146   :  { %v3896_v0 = vpack.c.bf16 %v1141_v56, %v1121_v40  ;;  %v3898_v1 = vpack.c.bf16 %v1143_v57, %v1123_v44  ;;  %v3473_v44 = vld [vmem:[#allocation9 + $0x200] sm:$0xff]   ;;  %v3485_v56 = vld [vmem:[#allocation9 + $0x218] sm:$0xff]  }
 0x147   :  { %3169 = vmatpush3.bf16.msra.mxu0 %v3461_v48  ;;  %3191 = vmatpush3.bf16.msra.mxu1 %v3462_v49  ;;  %v3900_v4 = vpack.c.bf16 %v1142_v60, %v1122_v50  ;;  %v3902_v5 = vpack.c.bf16 %v1144_v61, %v1124_v52  ;;  %v788_v14 = vpop.f32.mrb[16].mxu0  ;;  %v831_v15 = vpop.f32.mrb[16].mxu1  ;;  %v3475_v48 = vld [vmem:[#allocation9 + $0x248] sm:$0xff]   ;;  %v3479_v52 = vld [vmem:[#allocation9 + $0x250] sm:$0xff]   ;;  %v3486_v57 = vld [vmem:[#allocation9 + $0x298] sm:$0xff]  }
 0x148   :  { %3170 = vmatprep.subr.bf16.mxu0 %v3463_v54  ;;  %3192 = vmatprep.subr.bf16.mxu1 %v3464_v55  ;;  %v1085_v7 = vadd.f32 %v1036_v58, %v788_v14  ;;  %v790_v18 = vpop.f32.mrb[17].mxu0  ;;  %v1087_v8 = vadd.f32 %v1044_v59, %v831_v15  ;;  %v833_v10 = vpop.f32.mrb[17].mxu1  ;;  %v3476_v49 = vld [vmem:[#allocation9 + $0x2c8] sm:$0xff]   ;;  %v3481_v54 = vld [vmem:[#allocation9 + $0x210] sm:$0xff]  }
 0x149   :  { %v1086_v11 = vadd.f32 %v1040_v62, %v790_v18  ;;  %v792_v12 = vpop.f32.mrb[18].mxu0  ;;  %v1088_v16 = vadd.f32 %v1048_v63, %v833_v10  ;;  %v835_v19 = vpop.f32.mrb[18].mxu1  ;;  %v3477_v50 = vld [vmem:[#allocation9 + $0x208] sm:$0xff]   ;;  %v3482_v55 = vld [vmem:[#allocation9 + $0x290] sm:$0xff]   ;;  %v3502_v18 = vld [vmem:[#allocation9 + $0x2b8] sm:$0xff]  }
 0x14a   :  { %v1125_v20 = vmax.f32 %v1085_v7, 0.0  ;;  %v1105_v21 = vadd.f32 %v1036_v58, %v792_v12  ;;  %v1127_v22 = vmax.f32 %v1087_v8, 0.0  ;;  %v794_v23 = vpop.f32.mrb[19].mxu0  ;;  %v1107_v27 = vadd.f32 %v1044_v59, %v835_v19  ;;  %v837_v29 = vpop.f32.mrb[19].mxu1  ;;  %v3487_v58 = vld [vmem:[#allocation9 + $0x260] sm:$0xff]   ;;  %v3491_v60 = vld [vmem:[#allocation9 + $0x268] sm:$0xff]  }
 0x14b   :  { %3171 = vmatpush3.bf16.msra.mxu0 %v3465_v2  ;;  %3193 = vmatpush3.bf16.msra.mxu1 %v3466_v3  ;;  %v1126_v13 = vmax.f32 %v1086_v11, 0.0  ;;  %v1106_v32 = vadd.f32 %v1040_v62, %v794_v23  ;;  %v1128_v36 = vmax.f32 %v1088_v16, 0.0  ;;  %v1108_v9 = vadd.f32 %v1048_v63, %v837_v29  ;;  %v3488_v59 = vld [vmem:[#allocation9 + $0x2e0] sm:$0xff]   ;;  %v3492_v61 = vld [vmem:[#allocation9 + $0x2e8] sm:$0xff]   ;;  %v3495_v2 = vld [vmem:[#allocation9 + $0x270] sm:$0xff]  }
 0x14c   :  { %3172 = vmatprep.subr.bf16.mxu0 %v3467_v6  ;;  %3194 = vmatprep.subr.bf16.mxu1 %v3468_v17  ;;  %v1145_v35 = vmax.f32 %v1105_v21, 0.0  ;;  %v1147_v37 = vmax.f32 %v1107_v27, 0.0  ;;  %v3493_v62 = vld [vmem:[#allocation9 + $0x228] sm:$0xff]   ;;  %v3496_v3 = vld [vmem:[#allocation9 + $0x2f0] sm:$0xff]   ;;  %v3499_v6 = vld [vmem:[#allocation9 + $0x278] sm:$0xff]  }
 0x14d   :  { %v1146_v38 = vmax.f32 %v1106_v32, 0.0  ;;  %v1148_v39 = vmax.f32 %v1108_v9, 0.0  ;;  %v3494_v63 = vld [vmem:[#allocation9 + $0x2a8] sm:$0xff]   ;;  %v3497_v14 = vld [vmem:[#allocation9 + $0x230] sm:$0xff]   ;;  %v3500_v17 = vld [vmem:[#allocation9 + $0x2f8] sm:$0xff]  }
 0x14e   :  { %v3904_v40 = vpack.c.bf16 %v1145_v35, %v1125_v20  ;;  %v3906_v43 = vpack.c.bf16 %v1147_v37, %v1127_v22  ;;  %v3498_v15 = vld [vmem:[#allocation9 + $0x2b0] sm:$0xff]   ;;  %v3501_v7 = vld [vmem:[#allocation9 + $0x238] sm:$0xff]   ;;  %v3503_v8 = vld [vmem:[#allocation9 + $0x340] sm:$0xff]  }
 0x14f   :  { %3173 = vmatpush3.bf16.msra.mxu0 %v3469_v30  ;;  %3195 = vmatpush3.bf16.msra.mxu1 %v3470_v26  ;;  %v3908_v46 = vpack.c.bf16 %v1146_v38, %v1126_v13  ;;  %v3910_v47 = vpack.c.bf16 %v1148_v39, %v1128_v36  ;;  %v3504_v10 = vld [vmem:[#allocation9 + $0x3c0] sm:$0xff]   ;;  %v3507_v16 = vld [vmem:[#allocation9 + $0x348] sm:$0xff]   ;;  %v3511_v22 = vld [vmem:[#allocation9 + $0x350] sm:$0xff]  }
 0x150   :  { %3202 = vmatprep.subr.bf16.mxu0 %v3471_v33  ;;  %3224 = vmatprep.subr.bf16.mxu1 %v3472_v34  ;;  %v3505_v11 = vld [vmem:[#allocation9 + $0x300] sm:$0xff]   ;;  %v3508_v19 = vld [vmem:[#allocation9 + $0x3c8] sm:$0xff]   ;;  %v3512_v23 = vld [vmem:[#allocation9 + $0x3d0] sm:$0xff]  }
 0x151   :  { %v3506_v12 = vld [vmem:[#allocation9 + $0x380] sm:$0xff]   ;;  %v3509_v20 = vld [vmem:[#allocation9 + $0x308] sm:$0xff]   ;;  %v3513_v27 = vld [vmem:[#allocation9 + $0x310] sm:$0xff]  }
 0x152   :  { %2571 = vmatmul.mubr.bf16.vlgmr.msra.gmra.mrb[24].mxu0 %v3868_v41  ;;  %2612 = vmatmul.mubr.bf16.vlgmr.msra.gmra.mrb[24].mxu1 %v3870_v42  ;;  %v3483_v41 = vld [vmem:[#allocation9 + $0x258] sm:$0xff]   ;;  %v3510_v21 = vld [vmem:[#allocation9 + $0x388] sm:$0xff]   ;;  %v3514_v29 = vld [vmem:[#allocation9 + $0x390] sm:$0xff]  }
 0x153   :  { %3203 = vmatpush3.bf16.msra.mxu0 %v3473_v44  ;;  %3225 = vmatpush3.bf16.msra.mxu1 %v3474_v45  ;;  %v3484_v42 = vld [vmem:[#allocation9 + $0x2d8] sm:$0xff]   ;;  %v3519_v13 = vld [vmem:[#allocation9 + $0x360] sm:$0xff]   ;;  %v3523_v36 = vld [vmem:[#allocation9 + $0x368] sm:$0xff]  }
 0x154   :  { %3204 = vmatprep.subr.bf16.mxu0 %v3475_v48  ;;  %3226 = vmatprep.subr.bf16.mxu1 %v3476_v49  ;;  %v3517_v30 = vld [vmem:[#allocation9 + $0x318] sm:$0xff]   ;;  %v3520_v32 = vld [vmem:[#allocation9 + $0x3e0] sm:$0xff]   ;;  %v3524_v9 = vld [vmem:[#allocation9 + $0x3e8] sm:$0xff]  }
 0x155   :  { %2652 = vmatprep.mubr.bf16.mxu0 %v3888_v28  ;;  %2693 = vmatprep.mubr.bf16.mxu1 %v3890_v31  ;;  %v3489_v28 = vld [vmem:[#allocation9 + $0x220] sm:$0xff]   ;;  %v3518_v26 = vld [vmem:[#allocation9 + $0x398] sm:$0xff]   ;;  %v3525_v33 = vld [vmem:[#allocation9 + $0x328] sm:$0xff]  }
 0x156   :  { %v3490_v31 = vld [vmem:[#allocation9 + $0x2a0] sm:$0xff]   ;;  %v3526_v34 = vld [vmem:[#allocation9 + $0x3a8] sm:$0xff]   ;;  %v3527_v35 = vld [vmem:[#allocation9 + $0x370] sm:$0xff]  }
 0x157   :  { %3205 = vmatpush3.bf16.msra.mxu0 %v3477_v50  ;;  %3227 = vmatpush3.bf16.msra.mxu1 %v3478_v51  ;;  %v3528_v37 = vld [vmem:[#allocation9 + $0x3f0] sm:$0xff]   ;;  %v3531_v44 = vld [vmem:[#allocation9 + $0x378] sm:$0xff]   ;;  %v3535_v50 = vld [vmem:[#allocation9 + $0x440] sm:$0xff]  }
 0x158   :  { %3206 = vmatprep.subr.bf16.mxu0 %v3479_v52  ;;  %3228 = vmatprep.subr.bf16.mxu1 %v3480_v53  ;;  %v3529_v38 = vld [vmem:[#allocation9 + $0x330] sm:$0xff]   ;;  %v3532_v45 = vld [vmem:[#allocation9 + $0x3f8] sm:$0xff]   ;;  %v3536_v51 = vld [vmem:[#allocation9 + $0x4c0] sm:$0xff]  }
 0x159   :  { %v3530_v39 = vld [vmem:[#allocation9 + $0x3b0] sm:$0xff]   ;;  %v3533_v48 = vld [vmem:[#allocation9 + $0x338] sm:$0xff]   ;;  %v3537_v52 = vld [vmem:[#allocation9 + $0x400] sm:$0xff]  }
 0x15a   :  { %v3534_v49 = vld [vmem:[#allocation9 + $0x3b8] sm:$0xff]   ;;  %v3538_v53 = vld [vmem:[#allocation9 + $0x480] sm:$0xff]  }
 0x15b   :  { %3207 = vmatpush3.bf16.msra.mxu0 %v3481_v54  ;;  %3229 = vmatpush3.bf16.msra.mxu1 %v3482_v55  ;;  %v3539_v54 = vld [vmem:[#allocation9 + $0x448] sm:$0xff]  }
 0x15c   :  { %3208 = vmatprep.subr.bf16.mxu0 %v3483_v41  ;;  %3230 = vmatprep.subr.bf16.mxu1 %v3484_v42  ;;  %v3540_v55 = vld [vmem:[#allocation9 + $0x4c8] sm:$0xff]  }
 0x15d   :  { %v3541_v41 = vld [vmem:[#allocation9 + $0x408] sm:$0xff]  }
 0x15e   :  { %v3542_v42 = vld [vmem:[#allocation9 + $0x488] sm:$0xff]  }
 0x15f   :  { %3209 = vmatpush3.bf16.msra.mxu0 %v3485_v56  ;;  %3231 = vmatpush3.bf16.msra.mxu1 %v3486_v57  ;;  %v3543_v56 = vld [vmem:[#allocation9 + $0x450] sm:$0xff]  }
 0x160   :  { %3210 = vmatprep.subr.bf16.mxu0 %v3487_v58  ;;  %3232 = vmatprep.subr.bf16.mxu1 %v3488_v59  ;;  %v3544_v57 = vld [vmem:[#allocation9 + $0x4d0] sm:$0xff]  }
 0x161   :  { %v3545_v58 = vld [vmem:[#allocation9 + $0x410] sm:$0xff]  }
 0x162   :  { %v3546_v59 = vld [vmem:[#allocation9 + $0x490] sm:$0xff]  }
 0x163   :  { %3211 = vmatpush3.bf16.msra.mxu0 %v3489_v28  ;;  %3233 = vmatpush3.bf16.msra.mxu1 %v3490_v31  ;;  %v3549_v28 = vld [vmem:[#allocation9 + $0x418] sm:$0xff]  }
 0x164   :  { %3212 = vmatprep.subr.bf16.mxu0 %v3491_v60  ;;  %3234 = vmatprep.subr.bf16.mxu1 %v3492_v61  ;;  %v3550_v31 = vld [vmem:[#allocation9 + $0x498] sm:$0xff]   ;;  %v3551_v60 = vld [vmem:[#allocation9 + $0x460] sm:$0xff]  }
 0x165   :  { %v3552_v61 = vld [vmem:[#allocation9 + $0x4e0] sm:$0xff]  }
 0x167   :  { %3213 = vmatpush3.bf16.msra.mxu0 %v3493_v62  ;;  %3235 = vmatpush3.bf16.msra.mxu1 %v3494_v63  ;;  %v3555_v62 = vld [vmem:[#allocation9 + $0x468] sm:$0xff]  }
 0x168   :  { %3214 = vmatprep.subr.bf16.mxu0 %v3495_v2  ;;  %3236 = vmatprep.subr.bf16.mxu1 %v3496_v3  ;;  %v3556_v63 = vld [vmem:[#allocation9 + $0x4e8] sm:$0xff]  }
 0x169   :  { %v3557_v2 = vld [vmem:[#allocation9 + $0x428] sm:$0xff]  }
 0x16a   :  { %v3558_v3 = vld [vmem:[#allocation9 + $0x4a8] sm:$0xff]  }
 0x16b   :  { %3215 = vmatpush3.bf16.msra.mxu0 %v3497_v14  ;;  %3237 = vmatpush3.bf16.msra.mxu1 %v3498_v15  ;;  %v3559_v14 = vld [vmem:[#allocation9 + $0x470] sm:$0xff]  }
 0x16c   :  { %3216 = vmatprep.subr.bf16.mxu0 %v3499_v6  ;;  %3238 = vmatprep.subr.bf16.mxu1 %v3500_v17  ;;  %v3560_v15 = vld [vmem:[#allocation9 + $0x4f0] sm:$0xff]  }
 0x16d   :  { %v3561_v6 = vld [vmem:[#allocation9 + $0x430] sm:$0xff]  }
 0x16e   :  { %v3562_v17 = vld [vmem:[#allocation9 + $0x4b0] sm:$0xff]  }
 0x16f   :  { %3217 = vmatpush3.bf16.msra.mxu0 %v3501_v7  ;;  %3239 = vmatpush3.bf16.msra.mxu1 %v3502_v18  ;;  %v3563_v7 = vld [vmem:[#allocation9 + $0x478] sm:$0xff]  }
 0x170   :  { %3246 = vmatprep.subr.bf16.mxu0 %v3503_v8  ;;  %3268 = vmatprep.subr.bf16.mxu1 %v3504_v10  ;;  %v3564_v18 = vld [vmem:[#allocation9 + $0x4f8] sm:$0xff]  }
 0x171   :  { %v3565_v8 = vld [vmem:[#allocation9 + $0x438] sm:$0xff]  }
 0x172   :  { %2653 = vmatmul.mubr.bf16.vlgmr.msra.gmra.mrb[28].mxu0 %v3884_v24  ;;  %2694 = vmatmul.mubr.bf16.vlgmr.msra.gmra.mrb[28].mxu1 %v3886_v25  ;;  %v3515_v24 = vld [vmem:[#allocation9 + $0x358] sm:$0xff]  }
 0x173   :  { %3247 = vmatpush3.bf16.msra.mxu0 %v3505_v11  ;;  %3269 = vmatpush3.bf16.msra.mxu1 %v3506_v12  ;;  %v3516_v25 = vld [vmem:[#allocation9 + $0x3d8] sm:$0xff]  }
 0x174   :  { %3248 = vmatprep.subr.bf16.mxu0 %v3507_v16  ;;  %3270 = vmatprep.subr.bf16.mxu1 %v3508_v19  ;;  %v3566_v10 = vld [vmem:[#allocation9 + $0x4b8] sm:$0xff]   ;;  %v2953_v16 = vld [vmem:[%s3945_s4] ss:$0 sm:$0xff]  ;;  %s3702_s4 = smov [#allocation11]  }
 0x175   :  { %2734 = vmatprep.mubr.bf16.mxu0 %v3900_v4  ;;  %2775 = vmatprep.mubr.bf16.mxu1 %v3902_v5  ;;  %v3521_v4 = vld [vmem:[#allocation9 + $0x320] sm:$0xff]   ;;  %s2888_s17 = sshll.u32 %s3702_s4, 4  ;;  %s2889_s17 = int_to_ptr.vmem [resolvable:$true] %s2888_s17 }
 0x176   :  { %v3522_v5 = vld [vmem:[#allocation9 + $0x3a0] sm:$0xff]   ;;  %s3663_s18 = scalar_lea.vmem %s2889_s17, 256  ;;  %p3668_p5 = scmp.lt.s32.totalorder %s2889_s17, %s2889_s17 }
 0x177   :  { %3249 = vmatpush3.bf16.msra.mxu0 %v3509_v20  ;;  %3271 = vmatpush3.bf16.msra.mxu1 %v3510_v21  ;;  %p3664_p4 = scmp.ne.s32.totalorder %s2889_s17, %s3663_s18  ;;  %p3669_p6 = scmp.lt.s32.totalorder %s3663_s18, %s3663_s18 }
 0x178   :  { %3250 = vmatprep.subr.bf16.mxu0 %v3511_v22  ;;  %3272 = vmatprep.subr.bf16.mxu1 %v3512_v23 }
 0x179   :  { %p3670_p7 = por %p3669_p6, %p3668_p5 }
 0x17b   :  { %3251 = vmatpush3.bf16.msra.mxu0 %v3513_v27  ;;  %3273 = vmatpush3.bf16.msra.mxu1 %v3514_v29  ;;  %p3671_p8 = pnand %p3670_p7, %p3664_p4 }
 0x17c   :  { %3252 = vmatprep.subr.bf16.mxu0 %v3515_v24  ;;  %3274 = vmatprep.subr.bf16.mxu1 %v3516_v25 }
 0x17f   :  { %3253 = vmatpush3.bf16.msra.mxu0 %v3517_v30  ;;  %3275 = vmatpush3.bf16.msra.mxu1 %v3518_v26 }
 0x180   :  { %3254 = vmatprep.subr.bf16.mxu0 %v3519_v13  ;;  %3276 = vmatprep.subr.bf16.mxu1 %v3520_v32 }
 0x183   :  { %3255 = vmatpush3.bf16.msra.mxu0 %v3521_v4  ;;  %3277 = vmatpush3.bf16.msra.mxu1 %v3522_v5 }
 0x184   :  { %3256 = vmatprep.subr.bf16.mxu0 %v3523_v36  ;;  %3278 = vmatprep.subr.bf16.mxu1 %v3524_v9 }
 0x187   :  { %3257 = vmatpush3.bf16.msra.mxu0 %v3525_v33  ;;  %3279 = vmatpush3.bf16.msra.mxu1 %v3526_v34 }
 0x188   :  { %3258 = vmatprep.subr.bf16.mxu0 %v3527_v35  ;;  %3280 = vmatprep.subr.bf16.mxu1 %v3528_v37 }
 0x18b   :  { %3259 = vmatpush3.bf16.msra.mxu0 %v3529_v38  ;;  %3281 = vmatpush3.bf16.msra.mxu1 %v3530_v39 }
 0x18c   :  { %3260 = vmatprep.subr.bf16.mxu0 %v3531_v44  ;;  %3282 = vmatprep.subr.bf16.mxu1 %v3532_v45 }
 0x18f   :  { %3261 = vmatpush3.bf16.msra.mxu0 %v3533_v48  ;;  %3283 = vmatpush3.bf16.msra.mxu1 %v3534_v49 }
 0x190   :  { %3290 = vmatprep.subr.bf16.mxu0 %v3535_v50  ;;  %3312 = vmatprep.subr.bf16.mxu1 %v3536_v51 }
 0x192   :  { %2735 = vmatmul.mubr.bf16.vlgmr.msra.gmra.mrb[32].mxu0 %v3896_v0  ;;  %2776 = vmatmul.mubr.bf16.vlgmr.msra.gmra.mrb[32].mxu1 %v3898_v1  ;;  %v3547_v0 = vld [vmem:[#allocation9 + $0x458] sm:$0xff]  }
 0x193   :  { %3291 = vmatpush3.bf16.msra.mxu0 %v3537_v52  ;;  %3313 = vmatpush3.bf16.msra.mxu1 %v3538_v53  ;;  %v3548_v1 = vld [vmem:[#allocation9 + $0x4d8] sm:$0xff]  }
 0x194   :  { %3292 = vmatprep.subr.bf16.mxu0 %v3539_v54  ;;  %3314 = vmatprep.subr.bf16.mxu1 %v3540_v55 }
 0x195   :  { %2816 = vmatprep.mubr.bf16.mxu0 %v3908_v46  ;;  %2857 = vmatprep.mubr.bf16.mxu1 %v3910_v47  ;;  %v3553_v46 = vld [vmem:[#allocation9 + $0x420] sm:$0xff]  }
 0x196   :  { %v3554_v47 = vld [vmem:[#allocation9 + $0x4a0] sm:$0xff]  }
 0x197   :  { %3293 = vmatpush3.bf16.msra.mxu0 %v3541_v41  ;;  %3315 = vmatpush3.bf16.msra.mxu1 %v3542_v42 }
 0x198   :  { %3294 = vmatprep.subr.bf16.mxu0 %v3543_v56  ;;  %3316 = vmatprep.subr.bf16.mxu1 %v3544_v57 }
 0x19b   :  { %3295 = vmatpush3.bf16.msra.mxu0 %v3545_v58  ;;  %3317 = vmatpush3.bf16.msra.mxu1 %v3546_v59 }
 0x19c   :  { %3296 = vmatprep.subr.bf16.mxu0 %v3547_v0  ;;  %3318 = vmatprep.subr.bf16.mxu1 %v3548_v1 }
 0x19f   :  { %3297 = vmatpush3.bf16.msra.mxu0 %v3549_v28  ;;  %3319 = vmatpush3.bf16.msra.mxu1 %v3550_v31 }
 0x1a0   :  { %3298 = vmatprep.subr.bf16.mxu0 %v3551_v60  ;;  %3320 = vmatprep.subr.bf16.mxu1 %v3552_v61 }
 0x1a3   :  { %3299 = vmatpush3.bf16.msra.mxu0 %v3553_v46  ;;  %3321 = vmatpush3.bf16.msra.mxu1 %v3554_v47 }
 0x1a4   :  { %3300 = vmatprep.subr.bf16.mxu0 %v3555_v62  ;;  %3322 = vmatprep.subr.bf16.mxu1 %v3556_v63 }
 0x1a7   :  { %3301 = vmatpush3.bf16.msra.mxu0 %v3557_v2  ;;  %3323 = vmatpush3.bf16.msra.mxu1 %v3558_v3 }
 0x1a8   :  { %3302 = vmatprep.subr.bf16.mxu0 %v3559_v14  ;;  %3324 = vmatprep.subr.bf16.mxu1 %v3560_v15 }
 0x1ab   :  { %3303 = vmatpush3.bf16.msra.mxu0 %v3561_v6  ;;  %3325 = vmatpush3.bf16.msra.mxu1 %v3562_v17 }
 0x1ac   :  { %3304 = vmatprep.subr.bf16.mxu0 %v3563_v7  ;;  %3326 = vmatprep.subr.bf16.mxu1 %v3564_v18 }
 0x1af   :  { %3305 = vmatpush3.bf16.msra.mxu0 %v3565_v8  ;;  %3327 = vmatpush3.bf16.msra.mxu1 %v3566_v10 }
 0x1b2   :  { %2817 = vmatmul.mubr.bf16.vlgmr.msra.gmra.mrb[36].mxu0 %v3904_v40  ;;  %2858 = vmatmul.mubr.bf16.vlgmr.msra.gmra.mrb[36].mxu1 %v3906_v43 }
 0x205   :  { %v3130_v11 = vpop.f32.mrb[20].mxu0  ;;  %v3152_v12 = vpop.f32.mrb[20].mxu1 }
 0x206   :  { %v3131_v19 = vpop.f32.mrb[21].mxu0  ;;  %v3153_v20 = vpop.f32.mrb[21].mxu1 }
 0x207   :  { %v3132_v21 = vadd.f32 %v3131_v19, %v3130_v11  ;;  %v3154_v22 = vadd.f32 %v3153_v20, %v3152_v12  ;;  %v3133_v23 = vpop.f32.mrb[22].mxu0  ;;  %v3155_v27 = vpop.f32.mrb[22].mxu1 }
 0x208   :  { %v3134_v29 = vpop.f32.mrb[23].mxu0  ;;  %v3156_v24 = vpop.f32.mrb[23].mxu1 }
 0x209   :  { %v2491_v25 = vadd.f32 %v3132_v21, %v2953_v16  ;;  %v3135_v30 = vadd.f32 %v3134_v29, %v3133_v23  ;;  %v3157_v26 = vadd.f32 %v3156_v24, %v3155_v27 }
 0x20b   :  { %v2532_v40 = vadd.f32 %v3154_v22, %v2491_v25  ;;  %v2494_v13 = vadd.f32 %v3135_v30, %v2953_v16 }
 0x20d   :  { %v2535_v43 = vadd.f32 %v3157_v26, %v2494_v13 }
 0x225   :  { %v3174_v32 = vpop.f32.mrb[24].mxu0  ;;  %v3196_v4 = vpop.f32.mrb[24].mxu1 }
 0x226   :  { %v3175_v5 = vpop.f32.mrb[25].mxu0  ;;  %v3197_v36 = vpop.f32.mrb[25].mxu1 }
 0x227   :  { %v3176_v9 = vadd.f32 %v3175_v5, %v3174_v32  ;;  %v3198_v33 = vadd.f32 %v3197_v36, %v3196_v4  ;;  %v3177_v34 = vpop.f32.mrb[26].mxu0  ;;  %v3199_v35 = vpop.f32.mrb[26].mxu1 }
 0x228   :  { %v3178_v37 = vpop.f32.mrb[27].mxu0  ;;  %v3200_v38 = vpop.f32.mrb[27].mxu1 }
 0x229   :  { %v2573_v39 = vadd.f32 %v3176_v9, %v2532_v40  ;;  %v3179_v44 = vadd.f32 %v3178_v37, %v3177_v34  ;;  %v3201_v45 = vadd.f32 %v3200_v38, %v3199_v35 }
 0x22b   :  { %v2614_v48 = vadd.f32 %v3198_v33, %v2573_v39  ;;  %v2576_v49 = vadd.f32 %v3179_v44, %v2535_v43 }
 0x22d   :  { %v2617_v50 = vadd.f32 %v3201_v45, %v2576_v49 }
 0x245   :  { %v3218_v51 = vpop.f32.mrb[28].mxu0  ;;  %v3240_v52 = vpop.f32.mrb[28].mxu1 }
 0x246   :  { %v3219_v53 = vpop.f32.mrb[29].mxu0  ;;  %v3241_v54 = vpop.f32.mrb[29].mxu1 }
 0x247   :  { %v3220_v55 = vadd.f32 %v3219_v53, %v3218_v51  ;;  %v3242_v41 = vadd.f32 %v3241_v54, %v3240_v52  ;;  %v3221_v42 = vpop.f32.mrb[30].mxu0  ;;  %v3243_v56 = vpop.f32.mrb[30].mxu1 }
 0x248   :  { %v3222_v57 = vpop.f32.mrb[31].mxu0  ;;  %v3244_v58 = vpop.f32.mrb[31].mxu1 }
 0x249   :  { %v2655_v59 = vadd.f32 %v3220_v55, %v2614_v48  ;;  %v3223_v0 = vadd.f32 %v3222_v57, %v3221_v42  ;;  %v3245_v1 = vadd.f32 %v3244_v58, %v3243_v56 }
 0x24b   :  { %v2696_v28 = vadd.f32 %v3242_v41, %v2655_v59  ;;  %v2658_v31 = vadd.f32 %v3223_v0, %v2617_v50 }
 0x24d   :  { %v2699_v60 = vadd.f32 %v3245_v1, %v2658_v31 }
 0x265   :  { %v3262_v61 = vpop.f32.mrb[32].mxu0  ;;  %v3284_v46 = vpop.f32.mrb[32].mxu1 }
 0x266   :  { %v3263_v47 = vpop.f32.mrb[33].mxu0  ;;  %v3285_v62 = vpop.f32.mrb[33].mxu1 }
 0x267   :  { %v3264_v63 = vadd.f32 %v3263_v47, %v3262_v61  ;;  %v3286_v2 = vadd.f32 %v3285_v62, %v3284_v46  ;;  %v3265_v3 = vpop.f32.mrb[34].mxu0  ;;  %v3287_v14 = vpop.f32.mrb[34].mxu1 }
 0x268   :  { %v3266_v15 = vpop.f32.mrb[35].mxu0  ;;  %v3288_v6 = vpop.f32.mrb[35].mxu1 }
 0x269   :  { %v2737_v17 = vadd.f32 %v3264_v63, %v2696_v28  ;;  %v3267_v7 = vadd.f32 %v3266_v15, %v3265_v3  ;;  %v3289_v18 = vadd.f32 %v3288_v6, %v3287_v14 }
 0x26b   :  { %v2778_v8 = vadd.f32 %v3286_v2, %v2737_v17  ;;  %v2740_v10 = vadd.f32 %v3267_v7, %v2699_v60 }
 0x26d   :  { %v2781_v11 = vadd.f32 %v3289_v18, %v2740_v10 }
 0x285   :  { %v3306_v12 = vpop.f32.mrb[36].mxu0  ;;  %v3328_v16 = vpop.f32.mrb[36].mxu1 }
 0x286   :  { %v3307_v19 = vpop.f32.mrb[37].mxu0  ;;  %v3329_v20 = vpop.f32.mrb[37].mxu1 }
 0x287   :  { %v3308_v21 = vadd.f32 %v3307_v19, %v3306_v12  ;;  %v3330_v22 = vadd.f32 %v3329_v20, %v3328_v16  ;;  %v3309_v23 = vpop.f32.mrb[38].mxu0  ;;  %v3331_v27 = vpop.f32.mrb[38].mxu1 }
 0x288   :  { %v3310_v29 = vpop.f32.mrb[39].mxu0  ;;  %v3332_v24 = vpop.f32.mrb[39].mxu1 }
 0x289   :  { %v2819_v25 = vadd.f32 %v3308_v21, %v2778_v8  ;;  %v3311_v30 = vadd.f32 %v3310_v29, %v3309_v23  ;;  %v3333_v26 = vadd.f32 %v3332_v24, %v3331_v27 }
 0x28b   :  { %v2860_v40 = vadd.f32 %v3330_v22, %v2819_v25  ;;  %v2822_v13 = vadd.f32 %v3311_v30, %v2781_v11 }
 0x28d   :  { %2866 = vst [vmem:[#allocation11] sm:$0xff] %v2860_v40  ;;  %v2868_v43 = vsub.f32 0.0, %v2860_v40  ;;  %v2863_v32 = vadd.f32 %v3333_v26, %v2822_v13 }
 0x28f   :  { %v2870_v4 = vmul.f32 1.442695, %v2868_v43  ;;  %2867 = vst [vmem:[#allocation11 + $0x8] sm:$0xff] %v2863_v32  ;;  %v2869_v5 = vsub.f32 0.0, %v2863_v32 }
 0x291   :  { %3567 = vpow2.f32 %v2870_v4  ;;  %v2872_v36 = vmul.f32 1.442695, %v2869_v5 }
 0x293   :  { %3569 = vpow2.f32 %v2872_v36 }
 0x29b   :  { %v3568_v9 = vpop.eup %3567 }
 0x29c   :  { %v2874_v33 = vadd.f32 1.0, %v3568_v9 }
 0x29d   :  { %v3570_v34 = vpop.eup %3569 }
 0x29e   :  { %3571 = vrcp.f32 %v2874_v33  ;;  %v2875_v35 = vadd.f32 1.0, %v3570_v34 }
 0x2a0   :  { %3573 = vrcp.f32 %v2875_v35 }
 0x2a8   :  { %v3572_v37 = vpop.eup %3571 }
 0x2a9   :  { %2881 = vst.msk [vmem:[#allocation11] sm:$0xff] %vm2880_vm1, %v3572_v37 }
 0x2aa   :  { %v3574_v38 = vpop.eup %3573 }
 0x2ab   :  { %2882 = vst.msk [vmem:[#allocation11 + $0x8] sm:$0xff] %vm2880_vm1, %v3574_v38 }
 0x2ac   :  { %3674 = shalt.err (!%p3671_p8)
}
 0x2ad   :  { %s3675_s21 = scalar_lea.hbm %s3946_s5, 256 }
 0x2ae   :  { %p3676_p9 = scmp.ne.s32.totalorder %s3946_s5, %s3675_s21  ;;  %p3679_p10 = scmp.lt.u32.totalorder %s3675_s21, %s3946_s5 }
 0x2b0   :  { %p3681_p11 = pnand %p3679_p10, %p3676_p9 }
 0x2b2   :  { %3684 = shalt.err (!%p3681_p11)
}
 0x2b3   :  { %s3703_s26 = smov 128   ;;  %s3704_s27 = smov 8  }
 0x2b4   :  { %2894 = dma.vmem_to_hbm [thread:$0]  %s2889_s17, 256, %s3946_s5, [#allocation5], %s3703_s26, %s3703_s26, %s3704_s27  }
 0x2b5   :  { %3691 = dma.done.wait [#allocation5], 256  }
 0x2b6   :  { %3692 = vsyncadd [#allocation5], 4294967040 }
 0x2b7   :  { %2898 = vsyncpa [#allocation4], 1 }
 0x2b8   :  { %2899 = vsyncpa [#allocation7], 1 }
 0x2b9   :  { %2900 = vsyncpa [#allocation10], 1 }
 0x2ba   :  { %2901 = vsyncpa [#allocation5], 1 }

</bundles_post_ra>
